<compile_context>
chip_gen: v6e
topology: v6e:2x2x1
jax: 0.10.0
libtpu: 0.0.40
codegen_flags: <defaults>
</compile_context>

<pallas_src>
import functools
from itertools import combinations

import numpy as np

import jax
import jax.numpy as jnp
from jax.experimental import pallas as pl
from jax.experimental.pallas import tpu as pltpu


def _round_up(x, m):
    return ((x + m - 1) // m) * m


def _triplet_loss_kernel(idx_ref, e_ref, o_ref, *, margin, t_valid, tt, n_pad):
    c = pl.program_id(0)          # TensorCore split axis ("parallel")
    j = pl.program_id(1)          # reduction over triplet tiles ("arbitrary")

    @pl.when(j == 0)
    def _():
        o_ref[...] = jnp.zeros_like(o_ref)

    idx = idx_ref[...]                                      # (tt, 3) int32 triplet indices
    a = idx[:, 0:1]                                         # (tt, 1)
    p = idx[:, 1:2]
    n = idx[:, 2:3]

    # Signed one-hot selection matrices (exact 0 / +-1 values).
    col = jax.lax.broadcasted_iota(jnp.int32, (tt, n_pad), 1)
    oa = (col == a).astype(jnp.float32)                     # (tt, n_pad)
    op = (col == p).astype(jnp.float32)
    on = (col == n).astype(jnp.float32)
    s_ap = oa - op                                          # selects e[a] - e[p]
    s_an = oa - on                                          # selects e[a] - e[n]

    # MXU "gather": dp = e[a]-e[p], dn = e[a]-e[n]; f32 precision so it matches the
    # direct (embeddings[a]-embeddings[p]) formulation.
    e = e_ref[...]                                          # (n_pad, d_pad) f32, VMEM-resident
    dp = jnp.dot(s_ap, e, preferred_element_type=jnp.float32,
                 precision=jax.lax.Precision.HIGHEST)       # (tt, d_pad)
    dn = jnp.dot(s_an, e, preferred_element_type=jnp.float32,
                 precision=jax.lax.Precision.HIGHEST)

    row = jnp.sum(dp * dp - dn * dn, axis=-1, keepdims=True)   # ap_dist - an_dist, (tt, 1)
    hinge = jnp.maximum(row + margin, 0.0)

    # Mask padded triplet rows (global row index >= t_valid).
    gl = (c * pl.num_programs(1) + j) * tt + jax.lax.broadcasted_iota(jnp.int32, (tt, 1), 0)
    hinge = jnp.where(gl < t_valid, hinge, 0.0)

    # Per-step scalar reduce (XLU slot, overlapped with MXU) into the resident,
    # lane-dense per-core partial-sum block.
    o_ref[...] += jnp.sum(hinge)


def online_triplet_loss(embeddings, triplets, margin, *,
                        n_cores=2, max_tile_rows=1024,
                        vmem_limit_bytes=32 * 1024 * 1024):
    """Pallas equivalent of OnlineTripletLoss.forward given precomputed triplet indices.

    Returns (mean_loss, num_triplets).
    """
    T = int(triplets.shape[0])
    assert T > 0, "no triplets"
    N, D = embeddings.shape

    # Lane/sublane-dense padding (zero rows/cols do not change squared distances).
    n_pad = _round_up(max(N, 1), 128)
    d_pad = _round_up(D, 128)

    e = embeddings.astype(jnp.float32)
    e = jnp.pad(e, ((0, n_pad - N), (0, d_pad - D)))

    e_bytes = n_pad * d_pad * 4
    # TODO(synk): if embeddings ever exceed VMEM, tile E over a third grid axis instead
    # of keeping it resident; FinEvent batches (N ~ 1e2-1e3, D ~ 1e2) are far below this.
    assert 2 * e_bytes < vmem_limit_bytes, "embeddings too large to keep resident in VMEM"

    # Size the triplet tile by the f32 temporaries it creates (one-hots + gathered rows).
    per_row_bytes = 4 * (6 * n_pad + 3 * d_pad + 16)
    temp_budget = max(vmem_limit_bytes - 2 * e_bytes, vmem_limit_bytes // 4) // 2
    tt_cap = max(8, (temp_budget // per_row_bytes) // 8 * 8)

    rows_per_core = _round_up(-(-T // n_cores), 8)            # ceil(T / n_cores) -> sublane pack
    tt = max(8, min(max_tile_rows, tt_cap, rows_per_core))

    T_pad = _round_up(T, n_cores * tt)
    tiles_per_core = T_pad // (n_cores * tt)

    idx = triplets.astype(jnp.int32)
    if T_pad != T:
        idx = jnp.pad(idx, ((0, T_pad - T), (0, 0)))          # padded rows masked in-kernel

    kernel = functools.partial(
        _triplet_loss_kernel,
        margin=float(margin), t_valid=T, tt=tt, n_pad=n_pad,
    )

    partials = pl.pallas_call(
        kernel,
        out_shape=jax.ShapeDtypeStruct((n_cores, 8, 128), jnp.float32),
        grid_spec=pltpu.PrefetchScalarGridSpec(
            num_scalar_prefetch=0,
            grid=(n_cores, tiles_per_core),
            in_specs=[
                # streamed int32 triplet indices: 12 bytes per triplet
                pl.BlockSpec((tt, 3), lambda c, j: (c * tiles_per_core + j, 0)),
                # embeddings: full array, constant index map -> DMA'd once, VMEM-resident
                pl.BlockSpec((n_pad, d_pad), lambda c, j: (0, 0)),
            ],
            # per-core partial sum, resident across the reduction axis
            out_specs=pl.BlockSpec((1, 8, 128), lambda c, j: (c, 0, 0)),
        ),
        compiler_params=pltpu.CompilerParams(
            dimension_semantics=("parallel", "arbitrary"),
            vmem_limit_bytes=vmem_limit_bytes,
        ),
    )(idx, e)

    loss = jnp.sum(partials[:, 0, 0]) / T
    return loss, T


# --- host-side triplet selector (all valid triplets) -----------------------------------
# TODO(synk): the injected triplet_selector (e.g. hardest-negative mining) is data-dependent
# combinatorial logic with no clean Pallas equivalent; implemented here as an all-triplets
# selector on the host.
def all_triplets(labels):
    labels = np.asarray(labels)
    triplets = []
    for lab in sorted(set(labels.tolist())):
        pos_idx = np.where(labels == lab)[0]
        neg_idx = np.where(labels != lab)[0]
        if len(pos_idx) < 2 or len(neg_idx) == 0:
            continue
        for a, p in combinations(pos_idx.tolist(), 2):
            for n in neg_idx.tolist():
                triplets.append((a, p, n))
    return np.asarray(triplets, dtype=np.int32)


def reference_loss(embeddings, triplets, margin):
    a = embeddings[triplets[:, 0]]
    p = embeddings[triplets[:, 1]]
    n = embeddings[triplets[:, 2]]
    ap = jnp.sum((a - p) ** 2, axis=1)
    an = jnp.sum((a - n) ** 2, axis=1)
    return jnp.mean(jnp.maximum(ap - an + margin, 0.0))


if __name__ == "__main__":
    key = jax.random.PRNGKey(0)
    N, D, C = 13, 100, 3                  # hidden=100 (not a 128-multiple) exercises D padding
    margin = 1.0

    embeddings = jax.random.normal(key, (N, D), dtype=jnp.float32)
    labels = np.arange(N, dtype=np.int32) % C            # deterministic labels
    triplets = jnp.asarray(all_triplets(labels))          # (T, 3) int32

    loss, num_triplets = online_triplet_loss(embeddings, triplets, margin)
    loss = jax.block_until_ready(loss)

    ref = reference_loss(embeddings, triplets, margin)
    assert num_triplets == int(triplets.shape[0])
    assert jnp.allclose(loss, ref, atol=1e-4, rtol=1e-4), (float(loss), float(ref))

    print("KERNEL_OK")
</pallas_src>

<mosaic_0001>
module attributes {stable_mosaic.version = 11 : i64} {
  func.func @_triplet_loss_kernel(%arg0: i32, %arg1: i32, %arg2: memref<96x3xi32, #tpu.memory_space<vmem>>, %arg3: memref<128x128xf32, #tpu.memory_space<vmem>>, %arg4: memref<1x8x128xf32, #tpu.memory_space<vmem>>) attributes {dimension_semantics = [#tpu.dimension_semantics<parallel>, #tpu.dimension_semantics<arbitrary>], iteration_bounds = array<i64: 2, 1>, scalar_prefetch = 0 : i64, scratch_operands = 0 : i64, tpu.core_type = #tpu.core_type<tc>, window_params = [{transform_indices = @transform_0, window_bounds = array<i64: 96, 3>}, {pipeline_mode = #tpu.pipeline_mode<synchronous>, transform_indices = @transform_1, window_bounds = array<i64: 128, 128>}, {transform_indices = @transform_2, window_bounds = array<i64: 1, 8, 128>}]} {
    %c0_i32 = arith.constant 0 : i32
    %0 = arith.cmpi eq, %arg1, %c0_i32 : i32
    %1 = arith.extui %0 : i1 to i32
    %c0_i32_0 = arith.constant 0 : i32
    %2 = arith.cmpi ne, %1, %c0_i32_0 : i32
    scf.if %2 {
      %cst_16 = arith.constant 0.000000e+00 : f32
      %52 = vector.broadcast %cst_16 : f32 to vector<1x8x128xf32>
      %c0_17 = arith.constant 0 : index
      %c0_18 = arith.constant 0 : index
      %c0_19 = arith.constant 0 : index
      %53 = vector.load %arg4[%c0_17, %c0_18, %c0_19] : memref<1x8x128xf32, #tpu.memory_space<vmem>>, vector<1x8x128xf32>
      tpu.vector_store %arg4[%c0_17, %c0_18, %c0_19], %52 {strides = array<i32>} : memref<1x8x128xf32, #tpu.memory_space<vmem>>, vector<1x8x128xf32>,
    } else {
    }
    %c0 = arith.constant 0 : index
    %c0_1 = arith.constant 0 : index
    %3 = vector.load %arg2[%c0, %c0_1] : memref<96x3xi32, #tpu.memory_space<vmem>>, vector<96x3xi32>
    %4 = vector.extract_strided_slice %3 {offsets = [0, 0], sizes = [96, 1], strides = [1, 1]} : vector<96x3xi32> to vector<96x1xi32>
    %5 = vector.extract_strided_slice %3 {offsets = [0, 1], sizes = [96, 1], strides = [1, 1]} : vector<96x3xi32> to vector<96x1xi32>
    %6 = vector.extract_strided_slice %3 {offsets = [0, 2], sizes = [96, 1], strides = [1, 1]} : vector<96x3xi32> to vector<96x1xi32>
    %7 = tpu.iota {dimensions = array<i32: 1>} : vector<96x128xi32>
    %8 = vector.broadcast %4 : vector<96x1xi32> to vector<96x128xi32>
    %9 = arith.cmpi eq, %7, %8 : vector<96x128xi32>
    %10 = arith.extui %9 : vector<96x128xi1> to vector<96x128xi32>
    %11 = arith.sitofp %10 : vector<96x128xi32> to vector<96x128xf32>
    %12 = vector.broadcast %5 : vector<96x1xi32> to vector<96x128xi32>
    %13 = arith.cmpi eq, %7, %12 : vector<96x128xi32>
    %14 = arith.extui %13 : vector<96x128xi1> to vector<96x128xi32>
    %15 = arith.sitofp %14 : vector<96x128xi32> to vector<96x128xf32>
    %16 = vector.broadcast %6 : vector<96x1xi32> to vector<96x128xi32>
    %17 = arith.cmpi eq, %7, %16 : vector<96x128xi32>
    %18 = arith.extui %17 : vector<96x128xi1> to vector<96x128xi32>
    %19 = arith.sitofp %18 : vector<96x128xi32> to vector<96x128xf32>
    %20 = arith.subf %11, %15 : vector<96x128xf32>
    %21 = arith.subf %11, %19 : vector<96x128xf32>
    %c0_2 = arith.constant 0 : index
    %c0_3 = arith.constant 0 : index
    %22 = vector.load %arg3[%c0_2, %c0_3] : memref<128x128xf32, #tpu.memory_space<vmem>>, vector<128x128xf32>
    %cst = arith.constant dense<0.000000e+00> : vector<96x128xf32>
    %23 = tpu.matmul %20, %22, %cst {dimension_numbers = #tpu.dot_dimension_numbers<[1], [0], [0], [1], [0, 0, 1, 1], [], []>, precision = #tpu.contract_precision<fp32>} : vector<96x128xf32>, vector<128x128xf32>, vector<96x128xf32> -> vector<96x128xf32>
    %cst_4 = arith.constant dense<0.000000e+00> : vector<96x128xf32>
    %24 = tpu.matmul %21, %22, %cst_4 {dimension_numbers = #tpu.dot_dimension_numbers<[1], [0], [0], [1], [0, 0, 1, 1], [], []>, precision = #tpu.contract_precision<fp32>} : vector<96x128xf32>, vector<128x128xf32>, vector<96x128xf32> -> vector<96x128xf32>
    %25 = arith.mulf %23, %23 : vector<96x128xf32>
    %26 = arith.mulf %24, %24 : vector<96x128xf32>
    %27 = arith.subf %25, %26 : vector<96x128xf32>
    %cst_5 = arith.constant dense<0.000000e+00> : vector<96xf32>
    %28 = vector.multi_reduction <add>, %27, %cst_5 [1] : vector<96x128xf32> to vector<96xf32>
    %29 = vector.shape_cast %28 : vector<96xf32> to vector<96x1xf32>
    %cst_6 = arith.constant 1.000000e+00 : f32
    %30 = vector.broadcast %cst_6 : f32 to vector<96x1xf32>
    %31 = arith.addf %29, %30 : vector<96x1xf32>
    %cst_7 = arith.constant 0.000000e+00 : f32
    %32 = vector.broadcast %cst_7 : f32 to vector<96x1xf32>
    %33 = arith.maximumf %31, %32 : vector<96x1xf32>
    %c1_i32 = arith.constant 1 : i32
    %34 = arith.muli %arg0, %c1_i32 : i32
    %35 = arith.addi %34, %arg1 : i32
    %c96_i32 = arith.constant 96 : i32
    %36 = arith.muli %35, %c96_i32 : i32
    %37 = tpu.iota {dimensions = array<i32: 0>} : vector<96x1xi32>
    %38 = vector.broadcast %36 : i32 to vector<96x1xi32>
    %39 = arith.addi %38, %37 : vector<96x1xi32>
    %c188_i32 = arith.constant 188 : i32
    %40 = vector.broadcast %c188_i32 : i32 to vector<96x1xi32>
    %41 = arith.cmpi slt, %39, %40 : vector<96x1xi32>
    %cst_8 = arith.constant 0.000000e+00 : f32
    %42 = vector.broadcast %cst_8 : f32 to vector<96x1xf32>
    %43 = arith.select %41, %33, %42 : vector<96x1xi1>, vector<96x1xf32>
    %c0_9 = arith.constant 0 : index
    %c0_10 = arith.constant 0 : index
    %c0_11 = arith.constant 0 : index
    %44 = vector.load %arg4[%c0_9, %c0_10, %c0_11] : memref<1x8x128xf32, #tpu.memory_space<vmem>>, vector<1x8x128xf32>
    %45 = vector.shape_cast %43 : vector<96x1xf32> to vector<1x96x1xf32>
    %cst_12 = arith.constant dense<0.000000e+00> : vector<1xf32>
    %46 = vector.multi_reduction <add>, %45, %cst_12 [1, 2] : vector<1x96x1xf32> to vector<1xf32>
    %47 = vector.shape_cast %46 : vector<1xf32> to vector<1x1x1xf32>
    %48 = vector.extract %47[0, 0, 0] : f32 from vector<1x1x1xf32>
    %49 = vector.broadcast %48 : f32 to vector<1x8x128xf32>
    %50 = arith.addf %44, %49 : vector<1x8x128xf32>
    %c0_13 = arith.constant 0 : index
    %c0_14 = arith.constant 0 : index
    %c0_15 = arith.constant 0 : index
    %51 = vector.load %arg4[%c0_13, %c0_14, %c0_15] : memref<1x8x128xf32, #tpu.memory_space<vmem>>, vector<1x8x128xf32>
    tpu.vector_store %arg4[%c0_13, %c0_14, %c0_15], %50 {strides = array<i32>} : memref<1x8x128xf32, #tpu.memory_space<vmem>>, vector<1x8x128xf32>,
    return
  }
  func.func @transform_0(%arg0: i32, %arg1: i32) -> (i32, i32) {
    %c1_i32 = arith.constant 1 : i32
    %0 = arith.muli %arg0, %c1_i32 : i32
    %1 = arith.addi %0, %arg1 : i32
    %c0_i32 = arith.constant 0 : i32
    %c0_i32_0 = arith.constant 0 : i32
    return %1, %c0_i32 : i32, i32
  }
  func.func @transform_1(%arg0: i32, %arg1: i32) -> (i32, i32) {
    %c0_i32 = arith.constant 0 : i32
    %c0_i32_0 = arith.constant 0 : i32
    %c0_i32_1 = arith.constant 0 : i32
    return %c0_i32, %c0_i32_0 : i32, i32
  }
  func.func @transform_2(%arg0: i32, %arg1: i32) -> (i32, i32, i32) {
    %c0_i32 = arith.constant 0 : i32
    %c0_i32_0 = arith.constant 0 : i32
    %c0_i32_1 = arith.constant 0 : i32
    return %arg0, %c0_i32, %c0_i32_0 : i32, i32, i32
  }
}

</mosaic_0001>

<bundles_post_ra>
// kernel: tpu_custom_call.1
= control target key start
LH: loop header
LB: loop body
LE: loop exit
PB: predicated region body
PF: predicated region fallthrough
CT: control target
= control target key end

     0   :  { %7 = vsyncpa [#allocation3], 0  ;;  %s5496_s0 = inlined_call_operand.vmem [shape: s32[192,3], index: 0, kind: input, shape index: {}]   ;;  %s5497_s1 = inlined_call_operand.vmem [shape: f32[128,128], index: 1, kind: input, shape index: {}]   ;;  %s5498_s2 = inlined_call_operand.hbm [shape: f32[2,8,128], index: 2, kind: output, shape index: {}]  }
   0x1   :  { %9 = vsyncpa [#allocation3 + $0x1], 0  ;;  %s4069_s9 = smov 0   ;;  %s4071_s10 = smov 0  }
   0x2   :  { %s4073_s11 = smov 0   ;;  %s4075_s12 = smov 0  }
   0x3   :  { %s4077_s13 = smov 0   ;;  %s4079_s14 = smov 0  }
   0x4 LB: > { %s2920_s15 = sadd.s32 4294967295, %s4047_s14   ;;  %s2921_s16 = sadd.s32 4294967294, %s4047_s14   ;;  %s4047_s14 = sphi %s4079_s14, %s15_s14   ;;  %s4043_s13 = sphi %s4077_s13, %s5769_s13   ;;  %s4039_s12 = sphi %s4075_s12, %s5768_s12   ;;  %s4035_s11 = sphi %s4073_s11, %s5767_s11   ;;  %s4031_s10 = sphi %s4071_s10, %s5766_s10   ;;  %s4027_s9 = sphi %s4069_s9, %s5765_s9  }
   0x5   : > { %s27_s17 = sadd.s32 1, %s4043_s13  ;;  %s83_s18 = sadd.s32 1, %s4035_s11 }
   0x6   : > { %p29_p0 = scmp.ge.s32.totalorder %s27_s17, 2  ;;  %p93_p1 = scmp.ne.s32.totalorder %s4035_s11, %s4031_s10 }
   0x7   : > { %p94_p2 = scmp.eq.s32.totalorder %s2920_s15, 1  ;;  %p99_p3 = scmp.ne.s32.totalorder %s4031_s10, %s4027_s9 }
   0x8   : > { %s5771_s17 = smov (%p29_p0, %s27_s17), 0  ;;  %p100_p5 = scmp.eq.s32.totalorder %s2921_s16, 1 }
   0x9   : > { %p4109_p4 = por %p94_p2, %p93_p1  ;;  %s80_s20 = ssub.s32 %s4043_s13, %s5771_s17 }
   0xa   : > { %p2924_p6 = scmp.ge.s32.totalorder %s4047_s14, 1  ;;  %p81_p7 = scmp.eq.s32.totalorder %s80_s20, 0 }
   0xb   : > { %p4116_p8 = por %p100_p5, %p99_p3  ;;  %p132_p9 = scmp.lt.s32.totalorder %s4047_s14, 3 }
   0xc   : > { %s4122_s22 = scalar_select %p81_p7, %s4035_s11, %s83_s18  }
   0xd   : > { %p133_p10 = pnand %p2924_p6, %p132_p9 }
   0xf   : > { %136 = sbr.rel (%p133_p10) target bundleno = 980 (0x3d4), region = 28 }
  0x14   : > { %s156_s23 = smul.u32 12, %s4039_s12  ;;  %v437_v0 = vld [vmem:[%s5497_s1 + $0x78] sm:$0xff]  ;;  %v436_v1 = vld [vmem:[%s5497_s1 + $0x70] sm:$0xff]  ;;  %v4049_v2 = vmov 0   ;;  %v435_v5 = vld [vmem:[%s5497_s1 + $0x68] sm:$0xff]  ;;  %v4050_v44 = vmov 1  }
  0x15   : > { %3966 = vset.pattern.permute.xlu1 %v4049_v2  ;;  %3964 = vset.pattern.permute.xlu0 %v4049_v2  ;;  %v4133_v3 = vand.u32 4294901760, %v437_v0  ;;  %v4135_v4 = vand.u32 4294901760, %v436_v1  ;;  %v434_v6 = vld [vmem:[%s5497_s1 + $0x60] sm:$0xff]  ;;  %v433_v7 = vld [vmem:[%s5497_s1 + $0x58] sm:$0xff]  ;;  %v4146_v8 = vand.u32 4294901760, %v435_v5  ;;  %v432_v11 = vld [vmem:[%s5497_s1 + $0x50] sm:$0xff] }
  0x16   : > { %p157_p11 = scmp.lt.s32.totalorder %s156_s23, 23  ;;  %v4148_v9 = vand.u32 4294901760, %v434_v6  ;;  %v4150_v10 = vand.u32 4294901760, %v433_v7  ;;  %v431_v12 = vld [vmem:[%s5497_s1 + $0x48] sm:$0xff]  ;;  %v4172_v17 = vand.u32 4294901760, %v432_v11  ;;  %v430_v18 = vld [vmem:[%s5497_s1 + $0x40] sm:$0xff] }
  0x17   : > { %v4159_v13 = vsub.f32 %v437_v0, %v4133_v3  ;;  %v4162_v14 = vsub.f32 %v436_v1, %v4135_v4  ;;  %3303 = vmatprep.subr.mxu0 %v4133_v3  ;;  %v4166_v15 = vsub.f32 %v435_v5, %v4146_v8  ;;  %v4184_v21 = vand.u32 4294901760, %v431_v12  ;;  %v429_v31 = vld [vmem:[%s5497_s1 + $0x38] sm:$0xff]  ;;  %v428_v35 = vld [vmem:[%s5497_s1 + $0x30] sm:$0xff]  ;;  %v427_v40 = vld [vmem:[%s5497_s1 + $0x28] sm:$0xff]  ;;  %s2751_s25 = smul.u32 96, %s4039_s12  ;;  %s2964_s27 = sshll.u32 %s4039_s12, 7 }
  0x18   : > { %s5773_s23 = smov (!%p157_p11, %s156_s23), 23  ;;  %v4169_v16 = vsub.f32 %v434_v6, %v4148_v9  ;;  %3304 = vmatpush3.msra.mxu0 %v4133_v3  ;;  %v4190_v23 = vsub.f32 %v433_v7, %v4150_v10  ;;  %v4203_v26 = vand.u32 4294901760, %v430_v18  ;;  %v4215_v30 = vsub.f32 %v432_v11, %v4172_v17  ;;  %v426_v47 = vld [vmem:[%s5497_s1 + $0x20] sm:$0xff]  ;;  %v425_v53 = vld [vmem:[%s5497_s1 + $0x18] sm:$0xff]  ;;  %v424_v59 = vld [vmem:[%s5497_s1 + $0x10] sm:$0xff]  ;;  %s2851_s5 = scalar_lea.hbm %s5498_s2, %s2964_s27 }
  0x19   : > { %5612 = vst [vmem:[#allocation5_spill] sm:$0xff] %v4159_v13  ;;  %5613 = vst [vmem:[#allocation6_spill] sm:$0xff] %v4162_v14  ;;  %v4178_v19 = vand.u32 4294901760, %v4159_v13  ;;  %v4181_v20 = vand.u32 4294901760, %v4162_v14  ;;  %3305 = vmatprep.subr.mxu0 %v4135_v4  ;;  %s2926_s20 = sshll.u32 %s5773_s23, 3  ;;  %v4187_v22 = vand.u32 4294901760, %v4166_v15  ;;  %v4228_v34 = vsub.f32 %v431_v12, %v4184_v21 }
  0x1a   : > { %5614 = vst [vmem:[#allocation7_spill] sm:$0xff] %v4166_v15  ;;  %5615 = vst [vmem:[#allocation8_spill] sm:$0xff] %v4169_v16  ;;  %3306 = vmatpush3.msra.mxu0 %v4135_v4  ;;  %s4196_s26 = scalar_lea.vmem %s5496_s0, %s2926_s20  ;;  %v4212_v29 = vand.u32 4294901760, %v4169_v16  ;;  %v4234_v36 = vand.u32 4294901760, %v4190_v23  ;;  %v4241_v38 = vsub.f32 %v430_v18, %v4203_v26  ;;  %v4244_v39 = vand.u32 4294901760, %v429_v31  ;;  %v422_v18 = vld [vmem:[%s5497_s1] sm:$0xff] }
  0x1b   : > { %5616 = vst [vmem:[#allocation9_spill] sm:$0xff] %v4190_v23  ;;  %v643_v24 = vsub.f32 %v4159_v13, %v4178_v19  ;;  %v650_v25 = vsub.f32 %v4162_v14, %v4181_v20  ;;  %3307 = vmatprep.subr.mxu0 %v4146_v8  ;;  %v4206_v27 = vld [vmem:[%s4196_s26 + $0x8] sm:$0xff]  ;;  %v4209_v28 = vld [vmem:[%s4196_s26] sm:$0xff]  ;;  %5617 = vst [vmem:[#allocation10_spill] sm:$0xff] %v4215_v30  ;;  %v657_v33 = vsub.f32 %v4166_v15, %v4187_v22  ;;  %s4053_s8 = smov [#allocation2]  }
  0x1c   : > { %3308 = vmatpush3.msra.mxu0 %v4146_v8  ;;  %186 = vperm.xlu1 %3966, %v4206_v27   ;;  %5619 = vst [vmem:[#allocation12_spill] sm:$0xff] %v4228_v34  ;;  %5621 = vst [vmem:[#allocation14_spill] sm:$0xff] %v4241_v38  ;;  %v664_v41 = vsub.f32 %v4169_v16, %v4212_v29  ;;  %v4253_v42 = vand.u32 4294901760, %v4215_v30  ;;  %v4256_v43 = vand.u32 4294901760, %v428_v35  ;;  %v4261_v46 = vand.u32 4294901760, %v4228_v34  ;;  %v4276_v51 = vld [vmem:[%s4196_s26 + $0x10] sm:$0xff] }
  0x1d   : > { %183 = vperm.xlu0 %3964, %v4209_v28   ;;  %v4223_v32 = vand.u32 4294901760, %v643_v24  ;;  %3309 = vmatprep.subr.mxu0 %v4148_v9  ;;  %v4238_v37 = vand.u32 4294901760, %v650_v25  ;;  %v4258_v45 = vand.u32 4294901760, %v657_v33  ;;  %v671_v48 = vsub.f32 %v4190_v23, %v4234_v36  ;;  %v4318_v0 = vld [vmem:[%s4196_s26 + $0x18] sm:$0xff]  ;;  %s3975_s15 = sshll.u32 %s4053_s8, 4  ;;  %s3976_s15 = int_to_ptr.vmem [resolvable:$false] %s3975_s15 }
  0x1e   : > { %3310 = vmatpush3.msra.mxu0 %v4148_v9  ;;  %v4271_v49 = vsub.f32 %v429_v31, %v4244_v39  ;;  %v4273_v50 = vand.u32 4294901760, %v427_v40  ;;  %v4280_v52 = vand.u32 4294901760, %v4241_v38  ;;  %v4287_v54 = vand.u32 4294901760, %v664_v41  ;;  %s3977_s12 = scalar_lea.vmem %s3976_s15, 256 }
  0x1f   : > { %5618 = vst [vmem:[#allocation11_spill] sm:$0xff] %v4223_v32  ;;  %3353 = vmatprep.subr.mxu1 %v4223_v32  ;;  %5620 = vst [vmem:[#allocation13_spill] sm:$0xff] %v4238_v37  ;;  %3311 = vmatprep.subr.mxu0 %v4150_v10  ;;  %v678_v55 = vsub.f32 %v4215_v30, %v4253_v42  ;;  %v4293_v56 = vsub.f32 %v428_v35, %v4256_v43  ;;  %v4295_v57 = vand.u32 4294901760, %v426_v47  ;;  %v4359_v35 = vld [vmem:[%s4196_s26 + $0x20] sm:$0xff] }
  0x20   : > { %3354 = vmatpush3.msra.mxu1 %v4223_v32  ;;  %3967 = vset.pattern.permute.xlu1 %v4050_v44  ;;  %5622 = vst [vmem:[#allocation15_spill] sm:$0xff] %v4258_v45  ;;  %5623 = vst [vmem:[#allocation16_spill] sm:$0xff] %v4271_v49  ;;  %v685_v58 = vsub.f32 %v4228_v34, %v4261_v46  ;;  %v4306_v60 = vand.u32 4294901760, %v671_v48  ;;  %v4309_v61 = vand.u32 4294901760, %v4271_v49  ;;  %v4314_v63 = vand.u32 4294901760, %v425_v53 }
  0x21   : > { %3965 = vset.pattern.permute.xlu0 %v4050_v44  ;;  %258 = vperm.xlu1 %3967, %v4206_v27   ;;  %5624 = vst [vmem:[#allocation17_spill] sm:$0xff] %v4287_v54  ;;  %5625 = vst [vmem:[#allocation18_spill] sm:$0xff] %v4293_v56  ;;  %v4312_v62 = vsub.f32 %v427_v40, %v4273_v50  ;;  %v692_v1 = vsub.f32 %v4241_v38, %v4280_v52  ;;  %v4327_v5 = vand.u32 4294901760, %v678_v55  ;;  %v5648_v32 = vmov 0.0  }
  0x22   : > { %255 = vperm.xlu0 %3965, %v4209_v28   ;;  %3355 = vmatprep.subr.mxu1 %v4238_v37  ;;  %5626 = vst [vmem:[#allocation19_spill] sm:$0xff] %v4306_v60  ;;  %v4330_v6 = vand.u32 4294901760, %v4293_v56  ;;  %v4334_v7 = vsub.f32 %v426_v47, %v4295_v57  ;;  %v4336_v11 = vand.u32 4294901760, %v424_v59  ;;  %v4339_v12 = vand.u32 4294901760, %v685_v58 }
  0x23   : > { %3312 = vmatpush3.msra.mxu0 %v4150_v10  ;;  %3356 = vmatpush3.msra.mxu1 %v4238_v37  ;;  %5627 = vst [vmem:[#allocation20_spill] sm:$0xff] %v4312_v62  ;;  %5628 = vst [vmem:[#allocation21_spill] sm:$0xff] %v4327_v5  ;;  %v699_v24 = vsub.f32 %v4271_v49, %v4309_v61  ;;  %v4350_v25 = vand.u32 4294901760, %v4312_v62  ;;  %v4353_v31 = vsub.f32 %v425_v53, %v4314_v63  ;;  %v175_v37 = vld [vmem:[%s4196_s26 + $0x38] sm:$0xff] }
  0x24   : > { %3313 = vmatprep.subr.mxu0 %v4172_v17  ;;  %3357 = vmatprep.subr.mxu1 %v4258_v45  ;;  %5629 = vst [vmem:[#allocation22_spill] sm:$0xff] %v4334_v7  ;;  %5630 = vst [vmem:[#allocation23_spill] sm:$0xff] %v4339_v12  ;;  %v4362_v40 = vand.u32 4294901760, %v692_v1  ;;  %v706_v41 = vsub.f32 %v4293_v56, %v4330_v6  ;;  %v4369_v44 = vand.u32 4294901760, %v4334_v7  ;;  %v4374_v48 = vand.u32 4294901760, %v422_v18  ;;  %v4392_v1 = vld [vmem:[%s4196_s26 + $0x28] sm:$0xff] }
  0x25   : > { %3314 = vmatpush3.msra.mxu0 %v4172_v17  ;;  %3968 = vset.pattern.permute.xlu1 %v4049_v2  ;;  %v423_v2 = vld [vmem:[%s5497_s1 + $0x8] sm:$0xff]  ;;  %v4372_v47 = vsub.f32 %v424_v59, %v4336_v11  ;;  %v4380_v53 = vand.u32 4294901760, %v699_v24  ;;  %v713_v55 = vsub.f32 %v4312_v62, %v4350_v25  ;;  %v4385_v58 = vand.u32 4294901760, %v4353_v31 }
  0x26   : > { %261 = vperm.xlu0 %3965, %v4276_v51   ;;  %189 = vperm.xlu1 %3968, %v4276_v51   ;;  %v4355_v33 = vand.u32 4294901760, %v423_v2  ;;  %5631 = vst [vmem:[#allocation24_spill] sm:$0xff] %v4362_v40  ;;  %v4396_v24 = vand.u32 4294901760, %v706_v41 }
  0x27   : > { %3358 = vmatpush3.msra.mxu1 %v4258_v45  ;;  %3315 = vmatprep.subr.mxu0 %v4184_v21  ;;  %5632 = vst [vmem:[#allocation25_spill] sm:$0xff] %v4380_v53  ;;  %v4411_v41 = vand.u32 4294901760, %v713_v55 }
  0x28   : > { %3359 = vmatprep.subr.mxu1 %v4287_v54  ;;  %3316 = vmatpush3.msra.mxu0 %v4184_v21  ;;  %v4388_v59 = vsub.f32 %v423_v2, %v4355_v33  ;;  %5633 = vst [vmem:[#allocation26_spill] sm:$0xff] %v4396_v24  ;;  %v4405_v2 = vsub.f32 %v422_v18, %v4374_v48  ;;  %v4420_v18 = vld [vmem:[%s4196_s26 + $0x30] sm:$0xff] }
  0x29   : > { %3360 = vmatpush3.msra.mxu1 %v4287_v54  ;;  %3317 = vmatprep.subr.mxu0 %v4203_v26  ;;  %5635 = vst [vmem:[#allocation28_spill] sm:$0xff] %v4411_v41 }
  0x2a   : > { %264 = vperm.xlu0 %3965, %v4318_v0   ;;  %3361 = vmatprep.subr.mxu1 %v4306_v60  ;;  %v4416_v54 = vand.u32 4294901760, %v4388_v59  ;;  %v4430_v45 = vand.u32 4294901760, %v4405_v2 }
  0x2b   : > { %192 = vperm.xlu1 %3968, %v4318_v0   ;;  %3362 = vmatpush3.msra.mxu1 %v4306_v60  ;;  %v4402_v60 = vand.u32 4294901760, %v4372_v47 }
  0x2c   : > { %3363 = vmatprep.subr.mxu1 %v4327_v5  ;;  %3318 = vmatpush3.msra.mxu0 %v4203_v26  ;;  %5636 = vst [vmem:[#allocation29_spill] sm:$0xff] %v4416_v54  ;;  %5638 = vst [vmem:[#allocation31_spill] sm:$0xff] %v4430_v45 }
  0x2d   : > { %3364 = vmatpush3.msra.mxu1 %v4327_v5  ;;  %v720_v5 = vsub.f32 %v4334_v7, %v4369_v44  ;;  %3319 = vmatprep.subr.mxu0 %v4244_v39  ;;  %5634 = vst [vmem:[#allocation27_spill] sm:$0xff] %v4402_v60  ;;  %v734_v55 = vsub.f32 %v4372_v47, %v4402_v60 }
  0x2e   : > { %267 = vperm.xlu0 %3965, %v4359_v35   ;;  %3365 = vmatprep.subr.mxu1 %v4339_v12  ;;  %v748_v60 = vsub.f32 %v4405_v2, %v4430_v45 }
  0x2f   : > { %195 = vperm.xlu1 %3968, %v4359_v35   ;;  %3366 = vmatpush3.msra.mxu1 %v4339_v12  ;;  %v727_v12 = vsub.f32 %v4353_v31, %v4385_v58 }
  0x30   : > { %3367 = vmatprep.subr.mxu1 %v4362_v40  ;;  %3320 = vmatpush3.msra.mxu0 %v4244_v39 }
  0x31   : > { %3368 = vmatpush3.msra.mxu1 %v4362_v40  ;;  %v4424_v40 = vand.u32 4294901760, %v720_v5  ;;  %3321 = vmatprep.subr.mxu0 %v4256_v43  ;;  %v741_v5 = vsub.f32 %v4388_v59, %v4416_v54 }
  0x32   : > { %270 = vperm.xlu0 %3965, %v4392_v1   ;;  %3369 = vmatprep.subr.mxu1 %v4380_v53 }
  0x33   : > { %198 = vperm.xlu1 %3968, %v4392_v1   ;;  %3370 = vmatpush3.msra.mxu1 %v4380_v53  ;;  %5637 = vst [vmem:[#allocation30_spill] sm:$0xff] %v4424_v40  ;;  %v4436_v53 = vand.u32 4294901760, %v727_v12  ;;  %v4452_v12 = vand.u32 4294901760, %v741_v5  ;;  %v177_v5 = vld [vmem:[%s4196_s26 + $0x48] sm:$0xff] }
  0x34   : > { %3371 = vmatprep.subr.mxu1 %v4396_v24  ;;  %3322 = vmatpush3.msra.mxu0 %v4256_v43 }
  0x35   : > { %3372 = vmatpush3.msra.mxu1 %v4396_v24  ;;  %5639 = vst [vmem:[#allocation32_spill] sm:$0xff] %v4436_v53  ;;  %v4444_v24 = vand.u32 4294901760, %v734_v55  ;;  %3323 = vmatprep.subr.mxu0 %v4273_v50  ;;  %5641 = vst [vmem:[#allocation34_spill] sm:$0xff] %v4452_v12  ;;  %v4458_v55 = vand.u32 4294901760, %v748_v60  ;;  %v178_v60 = vld [vmem:[%s4196_s26 + $0x50] sm:$0xff] }
  0x36   : > { %273 = vperm.xlu0 %3965, %v4420_v18   ;;  %3373 = vmatprep.subr.mxu1 %v4411_v41 }
  0x37   : > { %201 = vperm.xlu1 %3968, %v4420_v18   ;;  %3374 = vmatpush3.msra.mxu1 %v4411_v41  ;;  %5640 = vst [vmem:[#allocation33_spill] sm:$0xff] %v4444_v24  ;;  %v176_v41 = vld [vmem:[%s4196_s26 + $0x40] sm:$0xff]  ;;  %5642 = vst [vmem:[#allocation35_spill] sm:$0xff] %v4458_v55 }
  0x38   : > { %3375 = vmatprep.subr.mxu1 %v4424_v40  ;;  %3324 = vmatpush3.msra.mxu0 %v4273_v50 }
  0x39   : > { %3376 = vmatpush3.msra.mxu1 %v4424_v40  ;;  %3325 = vmatprep.subr.mxu0 %v4295_v57 }
  0x3a   : > { %276 = vperm.xlu0 %3965, %v175_v37   ;;  %3377 = vmatprep.subr.mxu1 %v4436_v53 }
  0x3b   : > { %204 = vperm.xlu1 %3968, %v175_v37   ;;  %3378 = vmatpush3.msra.mxu1 %v4436_v53 }
  0x3c   : > { %3379 = vmatprep.subr.mxu1 %v4444_v24  ;;  %3326 = vmatpush3.msra.mxu0 %v4295_v57 }
  0x3d   : > { %3380 = vmatpush3.msra.mxu1 %v4444_v24  ;;  %3327 = vmatprep.subr.mxu0 %v4314_v63 }
  0x3e   : > { %279 = vperm.xlu0 %3965, %v176_v41   ;;  %3381 = vmatprep.subr.mxu1 %v4452_v12 }
  0x3f   : > { %207 = vperm.xlu1 %3968, %v176_v41   ;;  %3382 = vmatpush3.msra.mxu1 %v4452_v12  ;;  %v4051_v12 = vmov 2  }
  0x40   : > { %3383 = vmatprep.subr.mxu1 %v4458_v55  ;;  %3328 = vmatpush3.msra.mxu0 %v4314_v63 }
  0x41   : > { %3384 = vmatpush3.msra.mxu1 %v4458_v55  ;;  %3329 = vmatprep.subr.mxu0 %v4336_v11  ;;  %v179_v55 = vld [vmem:[%s4196_s26 + $0x58] sm:$0xff]  ;;  %s152_s26 = sand.u32 1, %s4031_s10  }
  0x42   : > { %282 = vperm.xlu0 %3965, %v177_v5   ;;  %3330 = vmatpush3.msra.mxu0 %v4336_v11  ;;  %s2925_s23 = sshll.u32 %s152_s26, 3  ;;  %s2840_s6 = scalar_lea.sflag [#allocation3], %s152_s26 }
  0x43   : > { %210 = vperm.xlu1 %3968, %v177_v5   ;;  %3331 = vmatprep.subr.mxu0 %v4355_v33  ;;  %s154_s28 = scalar_lea.vmem [#allocation2], %s2925_s23 }
  0x44   : > { %3453 = vmatprep.subr.mxu1 %v4133_v3  ;;  %3332 = vmatpush3.msra.mxu0 %v4355_v33  ;;  %s2853_s29 = sshll.u32 %s154_s28, 4  ;;  %s2854_s29 = int_to_ptr.vmem [resolvable:$true] %s2853_s29 }
  0x45   : > { %3333 = vmatprep.subr.mxu0 %v4374_v48  ;;  %s3971_s7 = scalar_lea.vmem %s2854_s29, 128  ;;  %p3978_p1 = scmp.lt.s32.totalorder %s2854_s29, %s3976_s15 }
  0x46   : > { %285 = vperm.xlu0 %3965, %v178_v60   ;;  %3334 = vmatpush3.msra.mxu0 %v4374_v48  ;;  %p3972_p12 = scmp.ne.s32.totalorder %s2854_s29, %s3971_s7  ;;  %p3979_p2 = scmp.lt.s32.totalorder %s3977_s12, %s3971_s7 }
  0x47   : > { %213 = vperm.xlu1 %3968, %v178_v60   ;;  %3403 = vmatprep.subr.mxu0 %v4159_v13 }
  0x48   : > { %p3973_p13 = pnand %p3972_p12, %p4109_p4  ;;  %p3980_p3 = por %p3979_p2, %p3978_p1 }
  0x4a   : > { %288 = vperm.xlu0 %3965, %v179_v55   ;;  %p3974_p0 = pneg %p3973_p13 }
  0x4b   : > { %216 = vperm.xlu1 %3968, %v179_v55  }
  0x4c   : > { %p3981_p5 = pnand %p3980_p3, %p3974_p0 }
  0x4e   : > { %3970 = vset.pattern.permute.xlu0 %v4051_v12 }
  0x4f   : > { %3969 = vset.pattern.permute.xlu1 %v4051_v12  ;;  %330 = vperm.xlu0 %3970, %v4206_v27   ;;  %v5527_v12 = vlaneseq }
  0x50   : > { %327 = vperm.xlu1 %3969, %v4209_v28  }
  0x51   : > { %v4487_v27 = vand.u32 127, %v5527_v12 }
  0x53   : > { %339 = vperm.xlu0 %3970, %v4359_v35  }
  0x54   : > { %333 = vperm.xlu1 %3969, %v4276_v51  }
  0x57   : > { %345 = vperm.xlu0 %3970, %v4420_v18  }
  0x58   : > { %336 = vperm.xlu1 %3969, %v4318_v0   ;;  %v5537_v0 = vmov 0.0  }
  0x5b   : > { %351 = vperm.xlu0 %3970, %v176_v41  }
  0x5c   : > { %342 = vperm.xlu1 %3969, %v4392_v1  }
  0x5f   : > { %357 = vperm.xlu0 %3970, %v178_v60  }
  0x60   : > { %348 = vperm.xlu1 %3969, %v175_v37  }
  0x64   : > { %354 = vperm.xlu1 %3969, %v177_v5  }
  0x68   : > { %360 = vperm.xlu1 %3969, %v179_v55  }
  0x97   : > { %v187_v28 = vpop.permute.xlu1 %186 }
  0x98   : > { %v184_v24 = vpop.permute.xlu0 %183  ;;  %vm219_vm0 = vcmp.eq.s32.totalorder %v4487_v27, %v187_v28 }
  0x99   : > { %vm218_vm1 = vcmp.eq.s32.totalorder %v4487_v27, %v184_v24  ;;  %v4494_v37 = vsel %vm219_vm0, 1.0, %v5537_v0 }
  0x9a   : > { %5643 = vst [vmem:[#allocation36_spill] sm:$0xff] %v4494_v37  ;;  %v4497_v1 = vsel %vm218_vm1, 1.0, %v5537_v0 }
  0x9b   : > { %5644 = vst [vmem:[#allocation37_spill] sm:$0xff] %v4497_v1 }
  0x9c   : > { %v259_v51 = vpop.permute.xlu1 %258 }
  0x9d   : > { %v256_v35 = vpop.permute.xlu0 %255  ;;  %vm291_vm2 = vcmp.eq.s32.totalorder %v4487_v27, %v259_v51 }
  0x9e   : > { %vm290_vm3 = vcmp.eq.s32.totalorder %v4487_v27, %v256_v35  ;;  %v2940_v41 = vsel %vm291_vm2, 1.0, %v5537_v0 }
  0x9f   : > { %v2939_v18 = vsel %vm290_vm3, 1.0, %v5537_v0  ;;  %v399_v55 = vsub.f32 %v4494_v37, %v2940_v41 }
  0xa0   : > { %v398_v24 = vsub.f32 %v4497_v1, %v2939_v18 }
  0xa1   : > { %v262_v5 = vpop.permute.xlu0 %261  ;;  %v4503_v60 = vand.u32 4294901760, %v399_v55  ;;  %v190_v51 = vpop.permute.xlu1 %189 }
  0xa2   : > { %v4505_v28 = vand.u32 4294901760, %v398_v24  ;;  %vm292_vm4 = vcmp.eq.s32.totalorder %v4487_v27, %v262_v5  ;;  %vm220_vm5 = vcmp.eq.s32.totalorder %v4487_v27, %v190_v51 }
  0xa3   : > { %5645 = vst [vmem:[#allocation38_spill] sm:$0xff] %v4503_v60  ;;  %v2941_v35 = vsel %vm292_vm4, 1.0, %v5537_v0  ;;  %v4511_v12 = vsub.f32 %v399_v55, %v4503_v60  ;;  %v4517_v41 = vsel %vm220_vm5, 1.0, %v5537_v0 }
  0xa4   : > { %v4514_v53 = vsub.f32 %v398_v24, %v4505_v28  ;;  %5646 = vst [vmem:[#allocation39_spill] sm:$0xff] %v4517_v41  ;;  %3385 = vmatprep.mubr.f32.mxu1 %v4505_v28  ;;  %v400_v18 = vsub.f32 %v4517_v41, %v2941_v35 }
  0xa5   : > { %3386 = vmatmul.mubr.f32.vlgmr.msra.gmra.mxu1 %v4503_v60  ;;  %v265_v5 = vpop.permute.xlu0 %264  ;;  %v5542_v55 = vand.u32 4294901760, %v4511_v12 }
  0xa6   : > { %vm293_vm6 = vcmp.eq.s32.totalorder %v4487_v27, %v265_v5  ;;  %v193_v40 = vpop.permute.xlu1 %192  ;;  %v5539_v51 = vand.u32 4294901760, %v4514_v53  ;;  %3454 = vmatpush3.msra.mxu1 %v4133_v3  ;;  %v4526_v24 = vand.u32 4294901760, %v400_v18 }
  0xa7   : > { %v2942_v37 = vsel %vm293_vm6, 1.0, %v5537_v0  ;;  %vm221_vm7 = vcmp.eq.s32.totalorder %v4487_v27, %v193_v40  ;;  %3455 = vmatprep.subr.mxu1 %v4135_v4  ;;  %v532_v41 = vsub.f32 %v4511_v12, %v5542_v55 }
  0xa8   : > { %v4532_v35 = vsel %vm221_vm7, 1.0, %v5537_v0  ;;  %v522_v5 = vsub.f32 %v4514_v53, %v5539_v51  ;;  %3456 = vmatpush3.msra.mxu1 %v4135_v4  ;;  %v4542_v1 = vsub.f32 %v400_v18, %v4526_v24  ;;  %3388 = vmatprep.mubr.f32.mxu1 %v4526_v24 }
  0xa9   : > { %5647 = vst [vmem:[#allocation40_spill] sm:$0xff] %v4532_v35  ;;  %v401_v40 = vsub.f32 %v4532_v35, %v2942_v37  ;;  %v268_v45 = vpop.permute.xlu0 %267  ;;  %3457 = vmatprep.subr.mxu1 %v4146_v8  ;;  %v533_v54 = vand.u32 4294901760, %v532_v41 }
  0xaa   : > { %vm294_vm8 = vcmp.eq.s32.totalorder %v4487_v27, %v268_v45  ;;  %v196_v0 = vpop.permute.xlu1 %195  ;;  %v523_v51 = vand.u32 4294901760, %v522_v5  ;;  %3458 = vmatpush3.msra.mxu1 %v4146_v8  ;;  %v5548_v37 = vand.u32 4294901760, %v4542_v1 }
  0xab   : > { %v4549_v55 = vand.u32 4294901760, %v401_v40  ;;  %v2943_v60 = vsel %vm294_vm8, 1.0, %v5648_v32  ;;  %vm222_vm9 = vcmp.eq.s32.totalorder %v4487_v27, %v196_v0  ;;  %3459 = vmatprep.subr.mxu1 %v4148_v9 }
  0xac   : > { %v4556_v18 = vsel %vm222_vm9, 1.0, %v5648_v32  ;;  %3335 = vmatprep.mubr.f32.mxu0 %v523_v51  ;;  %3460 = vmatpush3.msra.mxu1 %v4148_v9  ;;  %v542_v0 = vsub.f32 %v4542_v1, %v5548_v37 }
  0xad   : > { %5649 = vst [vmem:[#allocation41_spill] sm:$0xff] %v4556_v18  ;;  %v4560_v45 = vsub.f32 %v401_v40, %v4549_v55  ;;  %v402_v41 = vsub.f32 %v4556_v18, %v2943_v60  ;;  %3336 = vmatmul.mubr.f32.vlgmr.msra.gmra.mxu0 %v533_v54  ;;  %3389 = vmatmul.mubr.f32.gmra.mxu1 %v4549_v55  ;;  %v271_v5 = vpop.permute.xlu0 %270 }
  0xae   : > { %vm295_vm10 = vcmp.eq.s32.totalorder %v4487_v27, %v271_v5  ;;  %v199_v35 = vpop.permute.xlu1 %198  ;;  %3461 = vmatprep.subr.mxu1 %v4150_v10  ;;  %3404 = vmatpush3.msra.mxu0 %v4159_v13  ;;  %v543_v54 = vand.u32 4294901760, %v542_v0 }
  0xaf   : > { %v4570_v51 = vand.u32 4294901760, %v402_v41  ;;  %v2944_v40 = vsel %vm295_vm10, 1.0, %v5648_v32  ;;  %vm223_vm11 = vcmp.eq.s32.totalorder %v4487_v27, %v199_v35  ;;  %3462 = vmatpush3.msra.mxu1 %v4150_v10  ;;  %3405 = vmatprep.subr.mxu0 %v4162_v14  ;;  %v5554_v5 = vand.u32 4294901760, %v4560_v45 }
  0xb0   : > { %v4577_v60 = vsel %vm223_vm11, 1.0, %v5648_v32  ;;  %3463 = vmatprep.subr.mxu1 %v4172_v17  ;;  %3406 = vmatpush3.msra.mxu0 %v4162_v14 }
  0xb1   : > { %5650 = vst [vmem:[#allocation42_spill] sm:$0xff] %v4570_v51  ;;  %5651 = vst [vmem:[#allocation43_spill] sm:$0xff] %v4577_v60  ;;  %v4583_v37 = vsub.f32 %v402_v41, %v4570_v51  ;;  %v403_v13 = vsub.f32 %v4577_v60, %v2944_v40  ;;  %3338 = vmatprep.mubr.f32.mxu0 %v543_v54  ;;  %3391 = vmatprep.mubr.f32.mxu1 %v4570_v51  ;;  %v274_v35 = vpop.permute.xlu0 %273 }
  0xb2   : > { %vm296_vm12 = vcmp.eq.s32.totalorder %v4487_v27, %v274_v35  ;;  %v202_v0 = vpop.permute.xlu1 %201  ;;  %v552_v18 = vsub.f32 %v4560_v45, %v5554_v5  ;;  %3464 = vmatpush3.msra.mxu1 %v4172_v17  ;;  %3407 = vmatprep.subr.mxu0 %v4166_v15 }
  0xb3   : > { %v4593_v14 = vand.u32 4294901760, %v403_v13  ;;  %v2945_v41 = vsel %vm296_vm12, 1.0, %v5648_v32  ;;  %vm224_vm13 = vcmp.eq.s32.totalorder %v4487_v27, %v202_v0  ;;  %v5560_v40 = vand.u32 4294901760, %v4583_v37  ;;  %3465 = vmatprep.subr.mxu1 %v4184_v21  ;;  %3408 = vmatpush3.msra.mxu0 %v4166_v15 }
  0xb4   : > { %v4601_v54 = vsel %vm224_vm13, 1.0, %v5648_v32  ;;  %v553_v35 = vand.u32 4294901760, %v552_v18  ;;  %3466 = vmatpush3.msra.mxu1 %v4184_v21  ;;  %3409 = vmatprep.subr.mxu0 %v4169_v16 }
  0xb5   : > { %5652 = vst [vmem:[#allocation44_spill] sm:$0xff] %v4593_v14  ;;  %5653 = vst [vmem:[#allocation45_spill] sm:$0xff] %v4601_v54  ;;  %v4606_v5 = vsub.f32 %v403_v13, %v4593_v14  ;;  %v404_v60 = vsub.f32 %v4601_v54, %v2945_v41  ;;  %3392 = vmatmul.mubr.f32.gmra.mxu1 %v4593_v14  ;;  %v277_v0 = vpop.permute.xlu0 %276  ;;  %v562_v15 = vsub.f32 %v4583_v37, %v5560_v40 }
  0xb6   : > { %3467 = vmatprep.subr.mxu1 %v4203_v26  ;;  %3339 = vmatmul.mubr.f32.gmra.mxu0 %v553_v35  ;;  %vm297_vm14 = vcmp.eq.s32.totalorder %v4487_v27, %v277_v0  ;;  %v205_v18 = vpop.permute.xlu1 %204 }
  0xb7   : > { %3468 = vmatpush3.msra.mxu1 %v4203_v26  ;;  %v4616_v51 = vand.u32 4294901760, %v404_v60  ;;  %v2946_v13 = vsel %vm297_vm14, 1.0, %v5648_v32  ;;  %vm225_vm15 = vcmp.eq.s32.totalorder %v4487_v27, %v205_v18  ;;  %v563_v41 = vand.u32 4294901760, %v562_v15  ;;  %3410 = vmatpush3.msra.mxu0 %v4169_v16 }
  0xb8   : > { %3469 = vmatprep.subr.mxu1 %v4244_v39  ;;  %v4623_v40 = vsel %vm225_vm15, 1.0, %v5648_v32  ;;  %v5566_v35 = vand.u32 4294901760, %v4606_v5  ;;  %3411 = vmatprep.subr.mxu0 %v4190_v23 }
  0xb9   : > { %5654 = vst [vmem:[#allocation46_spill] sm:$0xff] %v4623_v40  ;;  %3470 = vmatpush3.msra.mxu1 %v4244_v39  ;;  %v4629_v0 = vsub.f32 %v404_v60, %v4616_v51  ;;  %v405_v54 = vsub.f32 %v4623_v40, %v2946_v13  ;;  %3341 = vmatprep.mubr.f32.mxu0 %v563_v41  ;;  %v280_v15 = vpop.permute.xlu0 %279 }
  0xba   : > { %3394 = vmatprep.mubr.f32.mxu1 %v4616_v51  ;;  %vm298_vm0 = vcmp.eq.s32.totalorder %v4487_v27, %v280_v15  ;;  %v208_v18 = vpop.permute.xlu1 %207  ;;  %v572_v16 = vsub.f32 %v4606_v5, %v5566_v35  ;;  %3412 = vmatpush3.msra.mxu0 %v4190_v23 }
  0xbb   : > { %3471 = vmatprep.subr.mxu1 %v4256_v43  ;;  %v4639_v14 = vand.u32 4294901760, %v405_v54  ;;  %v2947_v60 = vsel %vm298_vm0, 1.0, %v5648_v32  ;;  %vm226_vm1 = vcmp.eq.s32.totalorder %v4487_v27, %v208_v18  ;;  %v5572_v13 = vand.u32 4294901760, %v4629_v0  ;;  %3413 = vmatprep.subr.mxu0 %v4215_v30 }
  0xbc   : > { %3472 = vmatpush3.msra.mxu1 %v4256_v43  ;;  %v4647_v41 = vsel %vm226_vm1, 1.0, %v5648_v32  ;;  %v573_v15 = vand.u32 4294901760, %v572_v16  ;;  %3414 = vmatpush3.msra.mxu0 %v4215_v30 }
  0xbd   : > { %5655 = vst [vmem:[#allocation47_spill] sm:$0xff] %v4639_v14  ;;  %5656 = vst [vmem:[#allocation48_spill] sm:$0xff] %v4647_v41  ;;  %3473 = vmatprep.subr.mxu1 %v4273_v50  ;;  %v4652_v35 = vsub.f32 %v405_v54, %v4639_v14  ;;  %v406_v23 = vsub.f32 %v4647_v41, %v2947_v60  ;;  %3395 = vmatmul.mubr.f32.gmra.mxu1 %v4639_v14  ;;  %v283_v18 = vpop.permute.xlu0 %282 }
  0xbe   : > { %v582_v40 = vsub.f32 %v4629_v0, %v5572_v13  ;;  %3415 = vmatprep.subr.mxu0 %v4228_v34  ;;  %3342 = vmatmul.mubr.f32.gmra.mxu0 %v573_v15  ;;  %vm299_vm2 = vcmp.eq.s32.totalorder %v4487_v27, %v283_v18  ;;  %v211_v16 = vpop.permute.xlu1 %210 }
  0xbf   : > { %3474 = vmatpush3.msra.mxu1 %v4273_v50  ;;  %v4662_v30 = vand.u32 4294901760, %v406_v23  ;;  %v2948_v54 = vsel %vm299_vm2, 1.0, %v5648_v32  ;;  %vm227_vm3 = vcmp.eq.s32.totalorder %v4487_v27, %v211_v16  ;;  %3416 = vmatpush3.msra.mxu0 %v4228_v34  ;;  %v5578_v15 = vand.u32 4294901760, %v4652_v35 }
  0xc0   : > { %v583_v60 = vand.u32 4294901760, %v582_v40  ;;  %3475 = vmatprep.subr.mxu1 %v4295_v57  ;;  %v4669_v13 = vsel %vm227_vm3, 1.0, %v5648_v32  ;;  %3417 = vmatprep.subr.mxu0 %v4241_v38 }
  0xc1   : > { %5657 = vst [vmem:[#allocation49_spill] sm:$0xff] %v4669_v13  ;;  %3476 = vmatpush3.msra.mxu1 %v4295_v57  ;;  %v4675_v18 = vsub.f32 %v406_v23, %v4662_v30  ;;  %v407_v41 = vsub.f32 %v4669_v13, %v2948_v54  ;;  %3397 = vmatprep.mubr.f32.mxu1 %v4662_v30  ;;  %v286_v40 = vpop.permute.xlu0 %285 }
  0xc2   : > { %3344 = vmatprep.mubr.f32.mxu0 %v583_v60  ;;  %vm300_vm4 = vcmp.eq.s32.totalorder %v4487_v27, %v286_v40  ;;  %v214_v16 = vpop.permute.xlu1 %213  ;;  %v592_v34 = vsub.f32 %v4652_v35, %v5578_v15  ;;  %3418 = vmatpush3.msra.mxu0 %v4241_v38 }
  0xc3   : > { %3477 = vmatprep.subr.mxu1 %v4314_v63  ;;  %v4685_v14 = vand.u32 4294901760, %v407_v41  ;;  %v2949_v23 = vsel %vm300_vm4, 1.0, %v5648_v32  ;;  %vm228_vm5 = vcmp.eq.s32.totalorder %v4487_v27, %v214_v16  ;;  %3419 = vmatprep.subr.mxu0 %v4271_v49  ;;  %v5584_v54 = vand.u32 4294901760, %v4675_v18 }
  0xc4   : > { %3478 = vmatpush3.msra.mxu1 %v4314_v63  ;;  %v4693_v60 = vsel %vm228_vm5, 1.0, %v5648_v32  ;;  %v593_v40 = vand.u32 4294901760, %v592_v34  ;;  %3420 = vmatpush3.msra.mxu0 %v4271_v49 }
  0xc5   : > { %5658 = vst [vmem:[#allocation50_spill] sm:$0xff] %v4693_v60  ;;  %3479 = vmatprep.subr.mxu1 %v4336_v11  ;;  %v4698_v15 = vsub.f32 %v407_v41, %v4685_v14  ;;  %v408_v38 = vsub.f32 %v4693_v60, %v2949_v23  ;;  %3398 = vmatmul.mubr.f32.gmra.mxu1 %v4685_v14  ;;  %v289_v16 = vpop.permute.xlu0 %288 }
  0xc6   : > { %v602_v13 = vsub.f32 %v4675_v18, %v5584_v54  ;;  %3421 = vmatprep.subr.mxu0 %v4293_v56  ;;  %3345 = vmatmul.mubr.f32.gmra.mxu0 %v593_v40  ;;  %vm301_vm6 = vcmp.eq.s32.totalorder %v4487_v27, %v289_v16  ;;  %v217_v34 = vpop.permute.xlu1 %216 }
  0xc7   : > { %3480 = vmatpush3.msra.mxu1 %v4336_v11  ;;  %v4708_v49 = vand.u32 4294901760, %v408_v38  ;;  %v2950_v41 = vsel %vm301_vm6, 1.0, %v5648_v32  ;;  %vm229_vm7 = vcmp.eq.s32.totalorder %v4487_v27, %v217_v34  ;;  %3422 = vmatpush3.msra.mxu0 %v4293_v56  ;;  %v5586_v40 = vand.u32 4294901760, %v4698_v15 }
  0xc8   : > { %v603_v23 = vand.u32 4294901760, %v602_v13  ;;  %3481 = vmatprep.subr.mxu1 %v4355_v33  ;;  %v4715_v54 = vsel %vm229_vm7, 1.0, %v5648_v32  ;;  %3423 = vmatprep.subr.mxu0 %v4312_v62  ;;  %vm2803_vm6 = vcmask 7168  }
  0xc9   : > { %3482 = vmatpush3.msra.mxu1 %v4355_v33  ;;  %v4721_v16 = vsub.f32 %v408_v38, %v4708_v49  ;;  %v409_v60 = vsub.f32 %v4715_v54, %v2950_v41  ;;  %3400 = vmatprep.mubr.f32.mxu1 %v4708_v49  ;;  %v612_v13 = vsub.f32 %v4698_v15, %v5586_v40 }
  0xca   : > { %3347 = vmatprep.mubr.f32.mxu0 %v603_v23  ;;  %3424 = vmatpush3.msra.mxu0 %v4312_v62  ;;  %v5659_v62 = vand.u32 4294901760, %v4514_v53 }
  0xcb   : > { %3483 = vmatprep.subr.mxu1 %v4374_v48  ;;  %v4730_v34 = vand.u32 4294901760, %v409_v60  ;;  %3425 = vmatprep.subr.mxu0 %v4334_v7  ;;  %v621_v38 = vand.u32 4294901760, %v4721_v16  ;;  %v613_v41 = vand.u32 4294901760, %v612_v13 }
  0xcc   : > { %3484 = vmatpush3.msra.mxu1 %v4374_v48  ;;  %3426 = vmatpush3.msra.mxu0 %v4334_v7 }
  0xcd   : > { %3553 = vmatprep.subr.mxu1 %v4133_v3  ;;  %v4738_v23 = vsub.f32 %v409_v60, %v4730_v34  ;;  %3401 = vmatmul.mubr.f32.gmra.mxu1 %v4730_v34  ;;  %v622_v40 = vsub.f32 %v4721_v16, %v621_v38  ;;  %v5660_v60 = vand.u32 4294901760, %v4511_v12 }
  0xce   : > { %3427 = vmatprep.subr.mxu0 %v4353_v31  ;;  %3348 = vmatmul.mubr.f32.gmra.mxu0 %v613_v41  ;;  %v5661_v41 = vand.u32 4294901760, %v4542_v1 }
  0xcf   : > { %3485 = vmatprep.mubr.f32.mxu1 %v5659_v62  ;;  %v623_v13 = vand.u32 4294901760, %v622_v40  ;;  %3428 = vmatpush3.msra.mxu0 %v4353_v31  ;;  %v631_v7 = vand.u32 4294901760, %v4738_v23  ;;  %v5662_v40 = vand.u32 4294901760, %v4560_v45 }
  0xd0   : > { %3429 = vmatprep.subr.mxu0 %v4372_v47 }
  0xd1   : > { %3350 = vmatprep.mubr.f32.mxu0 %v623_v13  ;;  %3486 = vmatmul.mubr.f32.vlgmr.msra.gmra.mxu1 %v5660_v60  ;;  %v632_v56 = vsub.f32 %v4738_v23, %v631_v7  ;;  %v5664_v13 = vand.u32 4294901760, %v4606_v5  ;;  %v5679_v60 = vld [vmem:[#allocation19_spill] sm:$0xff] }
  0xd2   : > { %3554 = vmatpush3.msra.mxu1 %v4133_v3  ;;  %3488 = vmatprep.mubr.f32.mxu1 %v5661_v41  ;;  %v5680_v41 = vld [vmem:[#allocation21_spill] sm:$0xff] }
  0xd3   : > { %3555 = vmatprep.subr.mxu1 %v4135_v4  ;;  %3430 = vmatpush3.msra.mxu0 %v4372_v47  ;;  %v633_v62 = vand.u32 4294901760, %v632_v56  ;;  %v5663_v56 = vand.u32 4294901760, %v4583_v37 }
  0xd4   : > { %3556 = vmatpush3.msra.mxu1 %v4135_v4  ;;  %3431 = vmatprep.subr.mxu0 %v4388_v59 }
  0xd5   : > { %3557 = vmatprep.subr.mxu1 %v4146_v8  ;;  %3351 = vmatmul.mubr.f32.gmra.mxu0 %v633_v62 }
  0xd6   : > { %3432 = vmatpush3.msra.mxu0 %v4388_v59  ;;  %3489 = vmatmul.mubr.f32.gmra.mxu1 %v5662_v40  ;;  %v5682_v40 = vld [vmem:[#allocation23_spill] sm:$0xff] }
  0xd7   : > { %3558 = vmatpush3.msra.mxu1 %v4146_v8  ;;  %3433 = vmatprep.subr.mxu0 %v4405_v2 }
  0xd8   : > { %3435 = vmatprep.mubr.f32.mxu0 %v4514_v53  ;;  %3491 = vmatprep.mubr.f32.mxu1 %v5663_v56  ;;  %v5665_v53 = vand.u32 4294901760, %v4629_v0  ;;  %v5683_v56 = vld [vmem:[#allocation37_spill] sm:$0xff] }
  0xd9   : > { %3559 = vmatprep.subr.mxu1 %v4148_v9  ;;  %3434 = vmatpush3.msra.mxu0 %v4405_v2 }
  0xda   : > { %3560 = vmatpush3.msra.mxu1 %v4148_v9  ;;  %3503 = vmatprep.subr.mxu0 %v4178_v19 }
  0xdb   : > { %3561 = vmatprep.subr.mxu1 %v4150_v10  ;;  %3436 = vmatmul.mubr.f32.vlgmr.msra.gmra.mxu0 %v4511_v12  ;;  %v5666_v12 = vand.u32 4294901760, %v4652_v35 }
  0xdc   : > { %3492 = vmatmul.mubr.f32.gmra.mxu1 %v5664_v13  ;;  %3504 = vmatpush3.msra.mxu0 %v4178_v19 }
  0xdd   : > { %3562 = vmatpush3.msra.mxu1 %v4150_v10  ;;  %3438 = vmatprep.mubr.f32.mxu0 %v4542_v1  ;;  %v5667_v1 = vand.u32 4294901760, %v4675_v18 }
  0xde   : > { %3494 = vmatprep.mubr.f32.mxu1 %v5665_v53  ;;  %3505 = vmatprep.subr.mxu0 %v4181_v20  ;;  %v5684_v53 = vld [vmem:[#allocation24_spill] sm:$0xff] }
  0xdf   : > { %3563 = vmatprep.subr.mxu1 %v4172_v17  ;;  %3506 = vmatpush3.msra.mxu0 %v4181_v20 }
  0xe0   : > { %3564 = vmatpush3.msra.mxu1 %v4172_v17  ;;  %3507 = vmatprep.subr.mxu0 %v4187_v22 }
  0xe1   : > { %3565 = vmatprep.subr.mxu1 %v4184_v21  ;;  %3439 = vmatmul.mubr.f32.gmra.mxu0 %v4560_v45  ;;  %v5668_v45 = vand.u32 4294901760, %v4698_v15 }
  0xe2   : > { %3495 = vmatmul.mubr.f32.gmra.mxu1 %v5666_v12  ;;  %3508 = vmatpush3.msra.mxu0 %v4187_v22 }
  0xe3   : > { %3566 = vmatpush3.msra.mxu1 %v4184_v21  ;;  %3441 = vmatprep.mubr.f32.mxu0 %v4583_v37  ;;  %v5670_v37 = vld [vmem:[#allocation11_spill] sm:$0xff] }
  0xe4   : > { %3497 = vmatprep.mubr.f32.mxu1 %v5667_v1  ;;  %3509 = vmatprep.subr.mxu0 %v4212_v29 }
  0xe5   : > { %3567 = vmatprep.subr.mxu1 %v4203_v26  ;;  %3510 = vmatpush3.msra.mxu0 %v4212_v29 }
  0xe6   : > { %3568 = vmatpush3.msra.mxu1 %v4203_v26  ;;  %3511 = vmatprep.subr.mxu0 %v4234_v36 }
  0xe7   : > { %3569 = vmatprep.subr.mxu1 %v4244_v39  ;;  %3442 = vmatmul.mubr.f32.gmra.mxu0 %v4606_v5  ;;  %v5671_v5 = vld [vmem:[#allocation27_spill] sm:$0xff] }
  0xe8   : > { %3498 = vmatmul.mubr.f32.gmra.mxu1 %v5668_v45  ;;  %3512 = vmatpush3.msra.mxu0 %v4234_v36  ;;  %v5685_v45 = vld [vmem:[#allocation25_spill] sm:$0xff] }
  0xe9   : > { %3570 = vmatpush3.msra.mxu1 %v4244_v39  ;;  %3444 = vmatprep.mubr.f32.mxu0 %v4629_v0  ;;  %v5674_v0 = vld [vmem:[#allocation15_spill] sm:$0xff] }
  0xea   : > { %3500 = vmatprep.mubr.f32.mxu1 %v621_v38  ;;  %3513 = vmatprep.subr.mxu0 %v4253_v42  ;;  %v328_v38 = vpop.permute.xlu1 %327 }
  0xeb   : > { %3571 = vmatprep.subr.mxu1 %v4256_v43  ;;  %3514 = vmatpush3.msra.mxu0 %v4253_v42  ;;  %vm362_vm8 = vcmp.eq.s32.totalorder %v4487_v27, %v328_v38 }
  0xec   : > { %3572 = vmatpush3.msra.mxu1 %v4256_v43  ;;  %3515 = vmatprep.subr.mxu0 %v4261_v46  ;;  %v2951_v62 = vsel %vm362_vm8, 1.0, %v5648_v32 }
  0xed   : > { %3573 = vmatprep.subr.mxu1 %v4273_v50  ;;  %3445 = vmatmul.mubr.f32.gmra.mxu0 %v4652_v35  ;;  %v5673_v35 = vld [vmem:[#allocation29_spill] sm:$0xff]  ;;  %v410_v13 = vsub.f32 %v5683_v56, %v2951_v62 }
  0xee   : > { %3501 = vmatmul.mubr.f32.gmra.mxu1 %v631_v7  ;;  %3516 = vmatpush3.msra.mxu0 %v4261_v46  ;;  %v5669_v7 = vld [vmem:[#allocation38_spill] sm:$0xff]  ;;  %v334_v12 = vpop.permute.xlu1 %333 }
  0xef   : > { %3574 = vmatpush3.msra.mxu1 %v4273_v50  ;;  %3447 = vmatprep.mubr.f32.mxu0 %v4675_v18  ;;  %v5676_v18 = vld [vmem:[#allocation31_spill] sm:$0xff]  ;;  %v4893_v1 = vand.u32 4294901760, %v410_v13  ;;  %vm364_vm10 = vcmp.eq.s32.totalorder %v4487_v27, %v334_v12 }
  0xf0   : > { %3517 = vmatprep.subr.mxu0 %v4280_v52  ;;  %3575 = vmatprep.subr.mxu1 %v4295_v57 }
  0xf1   : > { %3585 = vmatprep.mubr.f32.mxu1 %v4505_v28  ;;  %3518 = vmatpush3.msra.mxu0 %v4280_v52 }
  0xf2   : > { %3576 = vmatpush3.msra.mxu1 %v4295_v57  ;;  %3519 = vmatprep.subr.mxu0 %v4309_v61 }
  0xf3   : > { %3577 = vmatprep.subr.mxu1 %v4314_v63  ;;  %3448 = vmatmul.mubr.f32.gmra.mxu0 %v4698_v15  ;;  %v5675_v15 = vld [vmem:[#allocation42_spill] sm:$0xff] }
  0xf4   : > { %3520 = vmatpush3.msra.mxu0 %v4309_v61  ;;  %3578 = vmatpush3.msra.mxu1 %v4314_v63 }
  0xf5   : > { %3450 = vmatprep.mubr.f32.mxu0 %v4721_v16  ;;  %3521 = vmatprep.subr.mxu0 %v4330_v6  ;;  %v5677_v16 = vld [vmem:[#allocation17_spill] sm:$0xff] }
  0xf6   : > { %3579 = vmatprep.subr.mxu1 %v4336_v11  ;;  %3522 = vmatpush3.msra.mxu0 %v4330_v6 }
  0xf7   : > { %3580 = vmatpush3.msra.mxu1 %v4336_v11  ;;  %3523 = vmatprep.subr.mxu0 %v4350_v25 }
  0xf8   : > { %3581 = vmatprep.subr.mxu1 %v4355_v33  ;;  %3451 = vmatmul.mubr.f32.gmra.mxu0 %v4738_v23  ;;  %v5678_v23 = vld [vmem:[#allocation44_spill] sm:$0xff] }
  0xf9   : > { %3524 = vmatpush3.msra.mxu0 %v4350_v25  ;;  %3582 = vmatpush3.msra.mxu1 %v4355_v33 }
  0xfa   : > { %3525 = vmatprep.subr.mxu0 %v4369_v44  ;;  %3535 = vmatprep.mubr.f32.mxu0 %v4505_v28  ;;  %v5672_v28 = vld [vmem:[#allocation13_spill] sm:$0xff] }
  0xfb   : > { %3583 = vmatprep.subr.mxu1 %v4374_v48  ;;  %3526 = vmatpush3.msra.mxu0 %v4369_v44 }
  0xfc   : > { %3584 = vmatpush3.msra.mxu1 %v4374_v48  ;;  %3527 = vmatprep.subr.mxu0 %v4385_v58 }
  0xfd   : > { %3586 = vmatmul.mubr.f32.vlgmr.msra.gmra.mxu1 %v5669_v7  ;;  %3653 = vmatprep.subr.mxu1 %v5670_v37 }
  0xfe   : > { %3528 = vmatpush3.msra.mxu0 %v4385_v58  ;;  %3588 = vmatprep.mubr.f32.mxu1 %v4526_v24 }
  0xff   : > { %3654 = vmatpush3.msra.mxu1 %v5670_v37  ;;  %3529 = vmatprep.subr.mxu0 %v5671_v5  ;;  %v5686_v37 = vld [vmem:[#allocation26_spill] sm:$0xff] }
 0x100   : > { %3655 = vmatprep.subr.mxu1 %v5672_v28  ;;  %3530 = vmatpush3.msra.mxu0 %v5671_v5 }
 0x101   : > { %3656 = vmatpush3.msra.mxu1 %v5672_v28  ;;  %3531 = vmatprep.subr.mxu0 %v5673_v35 }
 0x102   : > { %3589 = vmatmul.mubr.f32.gmra.mxu1 %v4549_v55  ;;  %3657 = vmatprep.subr.mxu1 %v5674_v0 }
 0x103   : > { %3532 = vmatpush3.msra.mxu0 %v5673_v35  ;;  %3591 = vmatprep.mubr.f32.mxu1 %v5675_v15 }
 0x104   : > { %3658 = vmatpush3.msra.mxu1 %v5674_v0  ;;  %3533 = vmatprep.subr.mxu0 %v5676_v18 }
 0x105   : > { %3659 = vmatprep.subr.mxu1 %v5677_v16  ;;  %3534 = vmatpush3.msra.mxu0 %v5676_v18  ;;  %v5703_v18 = vld [vmem:[#allocation48_spill] sm:$0xff] }
 0x106   : > { %3660 = vmatpush3.msra.mxu1 %v5677_v16  ;;  %3536 = vmatmul.mubr.f32.vlgmr.msra.gmra.mxu0 %v5669_v7  ;;  %v4905_v7 = vsub.f32 %v410_v13, %v4893_v1  ;;  %v5688_v16 = vld [vmem:[#allocation36_spill] sm:$0xff] }
 0x107   : > { %3592 = vmatmul.mubr.f32.gmra.mxu1 %v5678_v23  ;;  %3603 = vmatprep.subr.mxu0 %v4133_v3  ;;  %v5691_v13 = vld [vmem:[#allocation32_spill] sm:$0xff] }
 0x108   : > { %3661 = vmatprep.subr.mxu1 %v5679_v60  ;;  %3538 = vmatprep.mubr.f32.mxu0 %v4526_v24  ;;  %v5681_v24 = vld [vmem:[#allocation47_spill] sm:$0xff] }
 0x109   : > { %3594 = vmatprep.mubr.f32.mxu1 %v4616_v51  ;;  %3604 = vmatpush3.msra.mxu0 %v4133_v3 }
 0x10a   : > { %3662 = vmatpush3.msra.mxu1 %v5679_v60  ;;  %3605 = vmatprep.subr.mxu0 %v4135_v4  ;;  %v5594_v60 = vand.u32 4294901760, %v4905_v7 }
 0x10b   : > { %3663 = vmatprep.subr.mxu1 %v5680_v41  ;;  %3606 = vmatpush3.msra.mxu0 %v4135_v4 }
 0x10c   : > { %3664 = vmatpush3.msra.mxu1 %v5680_v41  ;;  %3539 = vmatmul.mubr.f32.gmra.mxu0 %v4549_v55  ;;  %v331_v55 = vpop.permute.xlu0 %330  ;;  %v5689_v41 = vld [vmem:[#allocation30_spill] sm:$0xff] }
 0x10d   : > { %3595 = vmatmul.mubr.f32.gmra.mxu1 %v5681_v24  ;;  %3607 = vmatprep.subr.mxu0 %v4146_v8  ;;  %vm363_vm9 = vcmp.eq.s32.totalorder %v4487_v27, %v331_v55 }
 0x10e   : > { %3665 = vmatprep.subr.mxu1 %v5682_v40  ;;  %3541 = vmatprep.mubr.f32.mxu0 %v5675_v15  ;;  %v2952_v28 = vsel %vm363_vm9, 1.0, %v5648_v32  ;;  %v5687_v15 = vld [vmem:[#allocation28_spill] sm:$0xff] }
 0x10f   : > { %3597 = vmatprep.mubr.f32.mxu1 %v4662_v30  ;;  %3608 = vmatpush3.msra.mxu0 %v4146_v8  ;;  %v411_v38 = vsub.f32 %v5688_v16, %v2952_v28  ;;  %v5693_v28 = vld [vmem:[#allocation33_spill] sm:$0xff] }
 0x110   : > { %3666 = vmatpush3.msra.mxu1 %v5682_v40  ;;  %3609 = vmatprep.subr.mxu0 %v4148_v9  ;;  %v340_v0 = vpop.permute.xlu0 %339 }
 0x111   : > { %3667 = vmatprep.subr.mxu1 %v5684_v53  ;;  %3610 = vmatpush3.msra.mxu0 %v4148_v9  ;;  %vm366_vm12 = vcmp.eq.s32.totalorder %v4487_v27, %v340_v0  ;;  %v4931_v40 = vand.u32 4294901760, %v411_v38  ;;  %v5694_v0 = vld [vmem:[#allocation41_spill] sm:$0xff] }
 0x112   : > { %3668 = vmatpush3.msra.mxu1 %v5684_v53  ;;  %3542 = vmatmul.mubr.f32.gmra.mxu0 %v5678_v23  ;;  %v2953_v23 = vsel %vm364_vm10, 1.0, %v5648_v32  ;;  %v1636_v53 = vsub.f32 %v4905_v7, %v5594_v60  ;;  %v2955_v12 = vsel %vm366_vm12, 1.0, %v5648_v32 }
 0x113   : > { %3598 = vmatmul.mubr.f32.gmra.mxu1 %v4685_v14  ;;  %3611 = vmatprep.subr.mxu0 %v4150_v10 }
 0x114   : > { %3669 = vmatprep.subr.mxu1 %v5685_v45  ;;  %3544 = vmatprep.mubr.f32.mxu0 %v4616_v51  ;;  %v337_v51 = vpop.permute.xlu1 %336  ;;  %v346_v55 = vpop.permute.xlu0 %345 }
 0x115   : > { %3600 = vmatprep.mubr.f32.mxu1 %v4708_v49  ;;  %3612 = vmatpush3.msra.mxu0 %v4150_v10  ;;  %vm365_vm11 = vcmp.eq.s32.totalorder %v4487_v27, %v337_v51  ;;  %vm368_vm14 = vcmp.eq.s32.totalorder %v4487_v27, %v346_v55  ;;  %v1637_v51 = vand.u32 4294901760, %v1636_v53  ;;  %v5699_v55 = vld [vmem:[#allocation43_spill] sm:$0xff] }
 0x116   : > { %3670 = vmatpush3.msra.mxu1 %v5685_v45  ;;  %3613 = vmatprep.subr.mxu0 %v4172_v17  ;;  %v2954_v56 = vsel %vm365_vm11, 1.0, %v5648_v32  ;;  %v5692_v45 = vld [vmem:[#allocation40_spill] sm:$0xff] }
 0x117   : > { %3671 = vmatprep.subr.mxu1 %v5686_v37  ;;  %3614 = vmatpush3.msra.mxu0 %v4172_v17 }
 0x118   : > { %3672 = vmatpush3.msra.mxu1 %v5686_v37  ;;  %3545 = vmatmul.mubr.f32.gmra.mxu0 %v5681_v24  ;;  %v343_v24 = vpop.permute.xlu1 %342  ;;  %v413_v37 = vsub.f32 %v5692_v45, %v2954_v56  ;;  %v352_v56 = vpop.permute.xlu0 %351 }
 0x119   : > { %3601 = vmatmul.mubr.f32.gmra.mxu1 %v4730_v34  ;;  %3615 = vmatprep.subr.mxu0 %v4184_v21  ;;  %vm367_vm13 = vcmp.eq.s32.totalorder %v4487_v27, %v343_v24  ;;  %vm370_vm0 = vcmp.eq.s32.totalorder %v4487_v27, %v352_v56 }
 0x11a   : > { %3673 = vmatprep.subr.mxu1 %v5687_v15  ;;  %3547 = vmatprep.mubr.f32.mxu0 %v4662_v30  ;;  %v5690_v30 = vld [vmem:[#allocation39_spill] sm:$0xff]  ;;  %v4965_v24 = vand.u32 4294901760, %v413_v37  ;;  %v2959_v56 = vsel %vm370_vm0, 1.0, %v5648_v32 }
 0x11b   : > { %3616 = vmatpush3.msra.mxu0 %v4184_v21  ;;  %3674 = vmatpush3.msra.mxu1 %v5687_v15  ;;  %v412_v62 = vsub.f32 %v5690_v30, %v2953_v23  ;;  %v414_v15 = vsub.f32 %v5694_v0, %v2955_v12  ;;  %v5695_v23 = vld [vmem:[#allocation34_spill] sm:$0xff]  ;;  %v2957_v30 = vsel %vm368_vm14, 1.0, %v5648_v32  ;;  %v5700_v12 = vld [vmem:[#allocation45_spill] sm:$0xff]  ;;  %v418_v35 = vsub.f32 %v5703_v18, %v2959_v56 }
 0x11c   : > { %3685 = vmatprep.mubr.f32.mxu1 %v4893_v1  ;;  %3617 = vmatprep.subr.mxu0 %v4203_v26  ;;  %v349_v16 = vpop.permute.xlu1 %348  ;;  %5696 = vst [vmem:[#allocation38_spill] sm:$0xff] %v4965_v24  ;;  %v416_v45 = vsub.f32 %v5700_v12, %v2957_v30 }
 0x11d   : > { %3675 = vmatprep.subr.mxu1 %v5689_v41  ;;  %3618 = vmatpush3.msra.mxu0 %v4203_v26  ;;  %v4972_v53 = vand.u32 4294901760, %v414_v15  ;;  %vm369_vm15 = vcmp.eq.s32.totalorder %v4487_v27, %v349_v16 }
 0x11e   : > { %3676 = vmatpush3.msra.mxu1 %v5689_v41  ;;  %3548 = vmatmul.mubr.f32.gmra.mxu0 %v4685_v14  ;;  %v4944_v14 = vand.u32 4294901760, %v412_v62  ;;  %v2956_v41 = vsel %vm367_vm13, 1.0, %v5648_v32  ;;  %v5001_v30 = vand.u32 4294901760, %v416_v45 }
 0x11f   : > { %3619 = vmatprep.subr.mxu0 %v4244_v39  ;;  %3677 = vmatprep.subr.mxu1 %v5691_v13  ;;  %5698 = vst [vmem:[#allocation11_spill] sm:$0xff] %v4972_v53 }
 0x120   : > { %3550 = vmatprep.mubr.f32.mxu0 %v4708_v49  ;;  %3620 = vmatpush3.msra.mxu0 %v4244_v39  ;;  %v4951_v49 = vsub.f32 %v411_v38, %v4931_v40  ;;  %v4962_v38 = vsub.f32 %v412_v62, %v4944_v14  ;;  %v415_v62 = vsub.f32 %v5699_v55, %v2956_v41  ;;  %v5702_v55 = vld [vmem:[#allocation46_spill] sm:$0xff] }
 0x121   : > { %3678 = vmatpush3.msra.mxu1 %v5691_v13  ;;  %3621 = vmatprep.subr.mxu0 %v4256_v43  ;;  %v5697_v13 = vld [vmem:[#allocation35_spill] sm:$0xff] }
 0x122   : > { %3679 = vmatprep.subr.mxu1 %v5693_v28  ;;  %3622 = vmatpush3.msra.mxu0 %v4256_v43  ;;  %v5597_v0 = vand.u32 4294901760, %v4962_v38  ;;  %v4997_v41 = vand.u32 4294901760, %v415_v62 }
 0x123   : > { %3680 = vmatpush3.msra.mxu1 %v5693_v28  ;;  %3551 = vmatmul.mubr.f32.gmra.mxu0 %v4730_v34  ;;  %v5593_v34 = vand.u32 4294901760, %v4951_v49  ;;  %v4982_v28 = vsub.f32 %v413_v37, %v4965_v24  ;;  %v4995_v37 = vsub.f32 %v414_v15, %v4972_v53 }
 0x124   : > { %3623 = vmatprep.subr.mxu0 %v4273_v50  ;;  %3681 = vmatprep.subr.mxu1 %v5695_v23  ;;  %5701 = vst [vmem:[#allocation13_spill] sm:$0xff] %v4997_v41  ;;  %v1656_v15 = vsub.f32 %v4962_v38, %v5597_v0  ;;  %v5042_v0 = vand.u32 4294901760, %v418_v35 }
 0x125   : > { %3624 = vmatpush3.msra.mxu0 %v4273_v50  ;;  %3635 = vmatprep.mubr.f32.mxu0 %v1637_v51  ;;  %v355_v51 = vpop.permute.xlu1 %354  ;;  %v1646_v16 = vsub.f32 %v4951_v49, %v5593_v34  ;;  %v5704_v56 = vand.u32 4294901760, %v4982_v28 }
 0x126   : > { %3682 = vmatpush3.msra.mxu1 %v5695_v23  ;;  %3625 = vmatprep.subr.mxu0 %v4295_v57  ;;  %v2958_v23 = vsel %vm369_vm15, 1.0, %v5648_v32  ;;  %vm371_vm1 = vcmp.eq.s32.totalorder %v4487_v27, %v355_v51  ;;  %v5705_v51 = vld [vmem:[#allocation5_spill] sm:$0xff] }
 0x127   : > { %3683 = vmatprep.subr.mxu1 %v5697_v13  ;;  %3626 = vmatpush3.msra.mxu0 %v4295_v57  ;;  %v417_v12 = vsub.f32 %v5702_v55, %v2958_v23  ;;  %v1647_v60 = vand.u32 4294901760, %v1646_v16  ;;  %v5018_v23 = vsub.f32 %v415_v62, %v4997_v41  ;;  %v5025_v16 = vsub.f32 %v416_v45, %v5001_v30 }
 0x128   : > { %3684 = vmatpush3.msra.mxu1 %v5697_v13  ;;  %3627 = vmatprep.subr.mxu0 %v4314_v63  ;;  %v358_v13 = vpop.permute.xlu0 %357  ;;  %v2960_v34 = vsel %vm371_vm1, 1.0, %v5648_v32  ;;  %v1657_v62 = vand.u32 4294901760, %v1656_v15 }
 0x129   : > { %3686 = vmatmul.mubr.f32.vlgmr.msra.gmra.mxu1 %v4931_v40  ;;  %3753 = vmatprep.subr.mxu1 %v4133_v3  ;;  %vm372_vm2 = vcmp.eq.s32.totalorder %v4487_v27, %v358_v13  ;;  %v361_v55 = vpop.permute.xlu1 %360  ;;  %v5032_v18 = vand.u32 4294901760, %v417_v12  ;;  %v1666_v13 = vsub.f32 %v4982_v28, %v5704_v56  ;;  %v1685_v56 = vand.u32 4294901760, %v5018_v23 }
 0x12a   : > { %3628 = vmatpush3.msra.mxu0 %v4314_v63  ;;  %3688 = vmatprep.mubr.f32.mxu1 %v4944_v14  ;;  %v2961_v45 = vsel %vm372_vm2, 1.0, %v5648_v32  ;;  %vm373_vm3 = vcmp.eq.s32.totalorder %v4487_v27, %v361_v55  ;;  %v5605_v27 = vand.u32 4294901760, %v5025_v16  ;;  %v5708_v55 = vld [vmem:[#allocation50_spill] sm:$0xff] }
 0x12b   : > { %3754 = vmatpush3.msra.mxu1 %v4133_v3  ;;  %3629 = vmatprep.subr.mxu0 %v4336_v11  ;;  %v5055_v5 = vsub.f32 %v417_v12, %v5032_v18 }
 0x12c   : > { %3755 = vmatprep.subr.mxu1 %v4135_v4  ;;  %3630 = vmatpush3.msra.mxu0 %v4336_v11 }
 0x12d   : > { %3756 = vmatpush3.msra.mxu1 %v4135_v4  ;;  %3631 = vmatprep.subr.mxu0 %v4355_v33 }
 0x12e   : > { %3689 = vmatmul.mubr.f32.gmra.mxu1 %v4965_v24  ;;  %3757 = vmatprep.subr.mxu1 %v4146_v8 }
 0x12f   : > { %3632 = vmatpush3.msra.mxu0 %v4355_v33  ;;  %3691 = vmatprep.mubr.f32.mxu1 %v4972_v53  ;;  %v5706_v53 = vld [vmem:[#allocation49_spill] sm:$0xff] }
 0x130   : > { %3758 = vmatpush3.msra.mxu1 %v4146_v8  ;;  %3633 = vmatprep.subr.mxu0 %v4374_v48  ;;  %v419_v24 = vsub.f32 %v5706_v53, %v2960_v34  ;;  %v2962_v34 = vsel %vm373_vm3, 1.0, %v5648_v32  ;;  %v5709_v53 = vld [vmem:[#allocation6_spill] sm:$0xff]  ;;  %v1686_v32 = vsub.f32 %v5018_v23, %v1685_v56 }
 0x131   : > { %3759 = vmatprep.subr.mxu1 %v4148_v9  ;;  %3634 = vmatpush3.msra.mxu0 %v4374_v48 }
 0x132   : > { %3760 = vmatpush3.msra.mxu1 %v4148_v9  ;;  %3636 = vmatmul.mubr.f32.vlgmr.msra.gmra.mxu0 %v1647_v60  ;;  %v5707_v60 = vand.u32 4294901760, %v4995_v37 }
 0x133   : > { %3692 = vmatmul.mubr.f32.gmra.mxu1 %v4997_v41  ;;  %3703 = vmatprep.subr.mxu0 %v5705_v51  ;;  %v420_v41 = vsub.f32 %v5708_v55, %v2961_v45  ;;  %v421_v45 = vsub.f32 %v4715_v54, %v2962_v34  ;;  %v5711_v34 = vld [vmem:[#allocation8_spill] sm:$0xff] }
 0x134   : > { %3761 = vmatprep.subr.mxu1 %v4150_v10  ;;  %3638 = vmatprep.mubr.f32.mxu0 %v1657_v62  ;;  %v1676_v15 = vsub.f32 %v4995_v37, %v5707_v60  ;;  %v1667_v62 = vand.u32 4294901760, %v1666_v13  ;;  %v5065_v60 = vand.u32 4294901760, %v419_v24  ;;  %v5710_v13 = vld [vmem:[#allocation7_spill] sm:$0xff] }
 0x135   : > { %3694 = vmatprep.mubr.f32.mxu1 %v5001_v30  ;;  %3704 = vmatpush3.msra.mxu0 %v5705_v51  ;;  %v5063_v51 = vsub.f32 %v418_v35, %v5042_v0  ;;  %v5074_v55 = vand.u32 4294901760, %v420_v41  ;;  %v1696_v35 = vsub.f32 %v5025_v16, %v5605_v27 }
 0x136   : > { %3762 = vmatpush3.msra.mxu1 %v4150_v10  ;;  %3705 = vmatprep.subr.mxu0 %v5709_v53  ;;  %v1677_v12 = vand.u32 4294901760, %v1676_v15  ;;  %v5606_v15 = vand.u32 4294901760, %v5055_v5  ;;  %v5084_v54 = vsub.f32 %v419_v24, %v5065_v60 }
 0x137   : > { %3763 = vmatprep.subr.mxu1 %v4172_v17  ;;  %3706 = vmatpush3.msra.mxu0 %v5709_v53  ;;  %v1687_v53 = vand.u32 4294901760, %v1686_v32  ;;  %v5094_v27 = vsub.f32 %v420_v41, %v5074_v55  ;;  %v1697_v24 = vand.u32 4294901760, %v1696_v35  ;;  %v5712_v32 = vld [vmem:[#allocation9_spill] sm:$0xff]  ;;  %v5713_v35 = vld [vmem:[#allocation10_spill] sm:$0xff] }
 0x138   : > { %3764 = vmatpush3.msra.mxu1 %v4172_v17  ;;  %3639 = vmatmul.mubr.f32.gmra.mxu0 %v1667_v62  ;;  %v5607_v62 = vand.u32 4294901760, %v5063_v51 }
 0x139   : > { %3695 = vmatmul.mubr.f32.gmra.mxu1 %v5032_v18  ;;  %3707 = vmatprep.subr.mxu0 %v5710_v13 }
 0x13a   : > { %3765 = vmatprep.subr.mxu1 %v4184_v21  ;;  %3641 = vmatprep.mubr.f32.mxu0 %v1677_v12  ;;  %v5089_v12 = vand.u32 4294901760, %v421_v45  ;;  %v1716_v41 = vsub.f32 %v5063_v51, %v5607_v62 }
 0x13b   : > { %3697 = vmatprep.mubr.f32.mxu1 %v5042_v0  ;;  %3708 = vmatpush3.msra.mxu0 %v5710_v13  ;;  %v1706_v13 = vsub.f32 %v5055_v5, %v5606_v15 }
 0x13c   : > { %3766 = vmatpush3.msra.mxu1 %v4184_v21  ;;  %3709 = vmatprep.subr.mxu0 %v5711_v34 }
 0x13d   : > { %3767 = vmatprep.subr.mxu1 %v4203_v26  ;;  %3710 = vmatpush3.msra.mxu0 %v5711_v34  ;;  %v5608_v34 = vand.u32 4294901760, %v5084_v54  ;;  %v1707_v15 = vand.u32 4294901760, %v1706_v13 }
 0x13e   : > { %3768 = vmatpush3.msra.mxu1 %v4203_v26  ;;  %3642 = vmatmul.mubr.f32.gmra.mxu0 %v1687_v53  ;;  %v5108_v53 = vsub.f32 %v421_v45, %v5089_v12  ;;  %v1717_v45 = vand.u32 4294901760, %v1716_v41  ;;  %v5716_v41 = vld [vmem:[#allocation14_spill] sm:$0xff] }
 0x13f   : > { %3698 = vmatmul.mubr.f32.gmra.mxu1 %v5065_v60  ;;  %3711 = vmatprep.subr.mxu0 %v5712_v32  ;;  %v1726_v62 = vsub.f32 %v5084_v54, %v5608_v34 }
 0x140   : > { %3769 = vmatprep.subr.mxu1 %v4244_v39  ;;  %3644 = vmatprep.mubr.f32.mxu0 %v1697_v24  ;;  %v5609_v24 = vand.u32 4294901760, %v5094_v27  ;;  %v1745_v13 = vand.u32 4294901760, %v5108_v53 }
 0x141   : > { %3700 = vmatprep.mubr.f32.mxu1 %v5074_v55  ;;  %3712 = vmatpush3.msra.mxu0 %v5712_v32  ;;  %v5714_v32 = vld [vmem:[#allocation12_spill] sm:$0xff]  ;;  %v1727_v34 = vand.u32 4294901760, %v1726_v62  ;;  %v5718_v62 = vld [vmem:[#allocation18_spill] sm:$0xff] }
 0x142   : > { %3770 = vmatpush3.msra.mxu1 %v4244_v39  ;;  %3713 = vmatprep.subr.mxu0 %v5713_v35 }
 0x143   : > { %3771 = vmatprep.subr.mxu1 %v4256_v43  ;;  %3714 = vmatpush3.msra.mxu0 %v5713_v35  ;;  %v1736_v35 = vsub.f32 %v5094_v27, %v5609_v24  ;;  %v5717_v24 = vld [vmem:[#allocation16_spill] sm:$0xff] }
 0x144   : > { %3772 = vmatpush3.msra.mxu1 %v4256_v43  ;;  %3645 = vmatmul.mubr.f32.gmra.mxu0 %v1707_v15  ;;  %v5715_v15 = vand.u32 4294901760, %v4905_v7 }
 0x145   : > { %3701 = vmatmul.mubr.f32.gmra.mxu1 %v5089_v12  ;;  %3715 = vmatprep.subr.mxu0 %v5714_v32 }
 0x146   : > { %3773 = vmatprep.subr.mxu1 %v4273_v50  ;;  %3647 = vmatprep.mubr.f32.mxu0 %v1717_v45  ;;  %v1746_v45 = vsub.f32 %v5108_v53, %v1745_v13 }
 0x147   : > { %3716 = vmatpush3.msra.mxu0 %v5714_v32  ;;  %3774 = vmatpush3.msra.mxu1 %v4273_v50  ;;  %v1737_v32 = vand.u32 4294901760, %v1736_v35  ;;  %v5721_v35 = vand.u32 4294901760, %v4951_v49 }
 0x148   : > { %3785 = vmatprep.mubr.f32.mxu1 %v5715_v15  ;;  %3717 = vmatprep.subr.mxu0 %v5716_v41  ;;  %v1747_v15 = vand.u32 4294901760, %v1746_v45 }
 0x149   : > { %3775 = vmatprep.subr.mxu1 %v4295_v57  ;;  %3718 = vmatpush3.msra.mxu0 %v5716_v41  ;;  %v5723_v41 = vand.u32 4294901760, %v4982_v28 }
 0x14a   : > { %3776 = vmatpush3.msra.mxu1 %v4295_v57  ;;  %3648 = vmatmul.mubr.f32.gmra.mxu0 %v1727_v34  ;;  %v5719_v34 = vld [vmem:[#allocation20_spill] sm:$0xff] }
 0x14b   : > { %3719 = vmatprep.subr.mxu0 %v5717_v24  ;;  %3777 = vmatprep.subr.mxu1 %v4314_v63 }
 0x14c   : > { %3650 = vmatprep.mubr.f32.mxu0 %v1737_v32  ;;  %3720 = vmatpush3.msra.mxu0 %v5717_v24  ;;  %v5720_v24 = vld [vmem:[#allocation22_spill] sm:$0xff] }
 0x14d   : > { %3778 = vmatpush3.msra.mxu1 %v4314_v63  ;;  %3721 = vmatprep.subr.mxu0 %v5718_v62 }
 0x14e   : > { %3779 = vmatprep.subr.mxu1 %v4336_v11  ;;  %3722 = vmatpush3.msra.mxu0 %v5718_v62 }
 0x14f   : > { %3780 = vmatpush3.msra.mxu1 %v4336_v11  ;;  %3651 = vmatmul.mubr.f32.gmra.mxu0 %v1747_v15 }
 0x150   : > { %3723 = vmatprep.subr.mxu0 %v5719_v34  ;;  %3781 = vmatprep.subr.mxu1 %v4355_v33 }
 0x151   : > { %3724 = vmatpush3.msra.mxu0 %v5719_v34  ;;  %3735 = vmatprep.mubr.f32.mxu0 %v4905_v7  ;;  %v5722_v7 = vand.u32 4294901760, %v4962_v38 }
 0x152   : > { %3782 = vmatpush3.msra.mxu1 %v4355_v33  ;;  %3725 = vmatprep.subr.mxu0 %v5720_v24 }
 0x153   : > { %3783 = vmatprep.subr.mxu1 %v4374_v48  ;;  %3726 = vmatpush3.msra.mxu0 %v5720_v24 }
 0x154   : > { %3784 = vmatpush3.msra.mxu1 %v4374_v48  ;;  %3727 = vmatprep.subr.mxu0 %v4353_v31 }
 0x155   : > { %3786 = vmatmul.mubr.f32.vlgmr.msra.gmra.mxu1 %v5721_v35  ;;  %3853 = vmatprep.subr.mxu1 %v4133_v3 }
 0x156   : > { %3728 = vmatpush3.msra.mxu0 %v4353_v31  ;;  %3788 = vmatprep.mubr.f32.mxu1 %v5722_v7  ;;  %v5724_v31 = vand.u32 4294901760, %v4995_v37 }
 0x157   : > { %3854 = vmatpush3.msra.mxu1 %v4133_v3  ;;  %3729 = vmatprep.subr.mxu0 %v4372_v47  ;;  %v5725_v3 = vand.u32 4294901760, %v5025_v16 }
 0x158   : > { %3855 = vmatprep.subr.mxu1 %v4135_v4  ;;  %3730 = vmatpush3.msra.mxu0 %v4372_v47 }
 0x159   : > { %3856 = vmatpush3.msra.mxu1 %v4135_v4  ;;  %3731 = vmatprep.subr.mxu0 %v4388_v59  ;;  %v5726_v4 = vand.u32 4294901760, %v5055_v5 }
 0x15a   : > { %3789 = vmatmul.mubr.f32.gmra.mxu1 %v5723_v41  ;;  %3857 = vmatprep.subr.mxu1 %v4146_v8 }
 0x15b   : > { %3732 = vmatpush3.msra.mxu0 %v4388_v59  ;;  %3791 = vmatprep.mubr.f32.mxu1 %v5724_v31  ;;  %v5734_v59 = vld [vmem:[#allocation31_spill] sm:$0xff] }
 0x15c   : > { %3858 = vmatpush3.msra.mxu1 %v4146_v8  ;;  %3733 = vmatprep.subr.mxu0 %v4405_v2  ;;  %v5727_v8 = vand.u32 4294901760, %v5063_v51 }
 0x15d   : > { %3859 = vmatprep.subr.mxu1 %v4148_v9  ;;  %3734 = vmatpush3.msra.mxu0 %v4405_v2 }
 0x15e   : > { %3860 = vmatpush3.msra.mxu1 %v4148_v9  ;;  %3736 = vmatmul.mubr.f32.vlgmr.msra.gmra.mxu0 %v4951_v49  ;;  %v5728_v9 = vand.u32 4294901760, %v5084_v54  ;;  %v5735_v49 = vld [vmem:[#allocation13_spill] sm:$0xff] }
 0x15f   : > { %3792 = vmatmul.mubr.f32.gmra.mxu1 %v1685_v56  ;;  %3803 = vmatprep.subr.mxu0 %v4178_v19 }
 0x160   : > { %3861 = vmatprep.subr.mxu1 %v4150_v10  ;;  %3738 = vmatprep.mubr.f32.mxu0 %v4962_v38 }
 0x161   : > { %3794 = vmatprep.mubr.f32.mxu1 %v5725_v3  ;;  %3804 = vmatpush3.msra.mxu0 %v4178_v19 }
 0x162   : > { %3862 = vmatpush3.msra.mxu1 %v4150_v10  ;;  %3805 = vmatprep.subr.mxu0 %v4181_v20 }
 0x163   : > { %3863 = vmatprep.subr.mxu1 %v4172_v17  ;;  %3806 = vmatpush3.msra.mxu0 %v4181_v20 }
 0x164   : > { %3864 = vmatpush3.msra.mxu1 %v4172_v17  ;;  %3739 = vmatmul.mubr.f32.gmra.mxu0 %v4982_v28  ;;  %v5729_v17 = vand.u32 4294901760, %v5094_v27 }
 0x165   : > { %3795 = vmatmul.mubr.f32.gmra.mxu1 %v5726_v4  ;;  %3807 = vmatprep.subr.mxu0 %v4187_v22  ;;  %v3387_v10 = vpop.f32.mrf.mxu1 }
 0x166   : > { %3865 = vmatprep.subr.mxu1 %v4184_v21  ;;  %3741 = vmatprep.mubr.f32.mxu0 %v4995_v37 }
 0x167   : > { %3797 = vmatprep.mubr.f32.mxu1 %v5727_v8  ;;  %3808 = vmatpush3.msra.mxu0 %v4187_v22 }
 0x168   : > { %3866 = vmatpush3.msra.mxu1 %v4184_v21  ;;  %3809 = vmatprep.subr.mxu0 %v4212_v29  ;;  %v786_v21 = vpop.f32.mrf.mxu1 }
 0x169   : > { %3867 = vmatprep.subr.mxu1 %v4203_v26  ;;  %3810 = vmatpush3.msra.mxu0 %v4212_v29 }
 0x16a   : > { %3868 = vmatpush3.msra.mxu1 %v4203_v26  ;;  %3742 = vmatmul.mubr.f32.gmra.mxu0 %v5018_v23 }
 0x16b   : > { %3798 = vmatmul.mubr.f32.gmra.mxu1 %v5728_v9  ;;  %3811 = vmatprep.subr.mxu0 %v4234_v36 }
 0x16c   : > { %3869 = vmatprep.subr.mxu1 %v4244_v39  ;;  %3744 = vmatprep.mubr.f32.mxu0 %v5025_v16 }
 0x16d   : > { %3800 = vmatprep.mubr.f32.mxu1 %v5729_v17  ;;  %3812 = vmatpush3.msra.mxu0 %v4234_v36  ;;  %v3337_v19 = vpop.f32.mrf.mxu0  ;;  %v3390_v29 = vpop.f32.mrf.mxu1 }
 0x16e   : > { %3870 = vmatpush3.msra.mxu1 %v4244_v39  ;;  %3813 = vmatprep.subr.mxu0 %v4253_v42  ;;  %v5219_v20 = vadd.f32 %v3387_v10, %v3337_v19 }
 0x16f   : > { %3871 = vmatprep.subr.mxu1 %v4256_v43  ;;  %3814 = vmatpush3.msra.mxu0 %v4253_v42  ;;  %v525_v22 = vpop.f32.mrf.mxu0  ;;  %v798_v42 = vpop.f32.mrf.mxu1 }
 0x170   : > { %3872 = vmatpush3.msra.mxu1 %v4256_v43  ;;  %3745 = vmatmul.mubr.f32.gmra.mxu0 %v5055_v5  ;;  %v5225_v26 = vadd.f32 %v786_v21, %v525_v22 }
 0x171   : > { %3801 = vmatmul.mubr.f32.gmra.mxu1 %v1745_v13  ;;  %3815 = vmatprep.subr.mxu0 %v4261_v46 }
 0x172   : > { %3873 = vmatprep.subr.mxu1 %v4273_v50  ;;  %3747 = vmatprep.mubr.f32.mxu0 %v5063_v51 }
 0x173   : > { %3816 = vmatpush3.msra.mxu0 %v4261_v46  ;;  %3874 = vmatpush3.msra.mxu1 %v4273_v50 }
 0x174   : > { %3885 = vmatprep.mubr.f32.mxu1 %v4893_v1  ;;  %3817 = vmatprep.subr.mxu0 %v4280_v52 }
 0x175   : > { %3875 = vmatprep.subr.mxu1 %v4295_v57  ;;  %3818 = vmatpush3.msra.mxu0 %v4280_v52  ;;  %v3393_v50 = vpop.f32.mrf.mxu1 }
 0x176   : > { %3876 = vmatpush3.msra.mxu1 %v4295_v57  ;;  %3748 = vmatmul.mubr.f32.gmra.mxu0 %v5084_v54  ;;  %v3340_v36 = vpop.f32.mrf.mxu0 }
 0x177   : > { %3819 = vmatprep.subr.mxu0 %v4309_v61  ;;  %3877 = vmatprep.subr.mxu1 %v4314_v63  ;;  %v5242_v39 = vadd.f32 %v3390_v29, %v3340_v36  ;;  %v810_v57 = vpop.f32.mrf.mxu1 }
 0x178   : > { %3750 = vmatprep.mubr.f32.mxu0 %v5094_v27  ;;  %3820 = vmatpush3.msra.mxu0 %v4309_v61  ;;  %v545_v43 = vpop.f32.mrf.mxu0 }
 0x179   : > { %3878 = vmatpush3.msra.mxu1 %v4314_v63  ;;  %3821 = vmatprep.subr.mxu0 %v4330_v6  ;;  %v5248_v46 = vadd.f32 %v798_v42, %v545_v43 }
 0x17a   : > { %3879 = vmatprep.subr.mxu1 %v4336_v11  ;;  %3822 = vmatpush3.msra.mxu0 %v4330_v6 }
 0x17b   : > { %3880 = vmatpush3.msra.mxu1 %v4336_v11  ;;  %3751 = vmatmul.mubr.f32.gmra.mxu0 %v5108_v53 }
 0x17c   : > { %3823 = vmatprep.subr.mxu0 %v4350_v25  ;;  %3881 = vmatprep.subr.mxu1 %v4355_v33 }
 0x17d   : > { %3824 = vmatpush3.msra.mxu0 %v4350_v25  ;;  %3835 = vmatprep.mubr.f32.mxu0 %v4893_v1  ;;  %v3396_v6 = vpop.f32.mrf.mxu1  ;;  %v5730_v25 = vld [vmem:[#allocation27_spill] sm:$0xff] }
 0x17e   : > { %3882 = vmatpush3.msra.mxu1 %v4355_v33  ;;  %3825 = vmatprep.subr.mxu0 %v4369_v44  ;;  %v3343_v52 = vpop.f32.mrf.mxu0  ;;  %v5731_v33 = vld [vmem:[#allocation29_spill] sm:$0xff] }
 0x17f   : > { %3883 = vmatprep.subr.mxu1 %v4374_v48  ;;  %3826 = vmatpush3.msra.mxu0 %v4369_v44  ;;  %v5262_v61 = vadd.f32 %v3393_v50, %v3343_v52  ;;  %v5732_v44 = vld [vmem:[#allocation38_spill] sm:$0xff]  ;;  %v822_v47 = vpop.f32.mrf.mxu1 }
 0x180   : > { %3884 = vmatpush3.msra.mxu1 %v4374_v48  ;;  %3827 = vmatprep.subr.mxu0 %v4385_v58  ;;  %v565_v63 = vpop.f32.mrf.mxu0  ;;  %v5733_v48 = vld [vmem:[#allocation11_spill] sm:$0xff] }
 0x181   : > { %3886 = vmatmul.mubr.f32.vlgmr.msra.gmra.mxu1 %v4931_v40  ;;  %3828 = vmatpush3.msra.mxu0 %v4385_v58  ;;  %v5268_v11 = vadd.f32 %v810_v57, %v565_v63 }
 0x182   : > { %3888 = vmatprep.mubr.f32.mxu1 %v4944_v14  ;;  %3829 = vmatprep.subr.mxu0 %v5730_v25 }
 0x183   : > { %3830 = vmatpush3.msra.mxu0 %v5730_v25 }
 0x184   : > { %3831 = vmatprep.subr.mxu0 %v5731_v33 }
 0x185   : > { %3889 = vmatmul.mubr.f32.gmra.mxu1 %v5732_v44  ;;  %3832 = vmatpush3.msra.mxu0 %v5731_v33  ;;  %v3399_v5 = vpop.f32.mrf.mxu1 }
 0x186   : > { %3891 = vmatprep.mubr.f32.mxu1 %v5733_v48  ;;  %3833 = vmatprep.subr.mxu0 %v5734_v59  ;;  %v3346_v58 = vpop.f32.mrf.mxu0 }
 0x187   : > { %3834 = vmatpush3.msra.mxu0 %v5734_v59  ;;  %v829_v2 = vadd.f32 %v3396_v6, %v3346_v58  ;;  %v834_v28 = vpop.f32.mrf.mxu1 }
 0x188   : > { %3836 = vmatmul.mubr.f32.vlgmr.msra.gmra.mxu0 %v4931_v40  ;;  %v585_v1 = vpop.f32.mrf.mxu0 }
 0x189   : > { %3892 = vmatmul.mubr.f32.gmra.mxu1 %v5735_v49  ;;  %3838 = vmatprep.mubr.f32.mxu0 %v4944_v14  ;;  %v823_v38 = vadd.f32 %v822_v47, %v585_v1 }
 0x18a   : > { %3894 = vmatprep.mubr.f32.mxu1 %v5001_v30 }
 0x18c   : > { %3839 = vmatmul.mubr.f32.gmra.mxu0 %v5732_v44 }
 0x18d   : > { %3895 = vmatmul.mubr.f32.gmra.mxu1 %v5032_v18  ;;  %3841 = vmatprep.mubr.f32.mxu0 %v5733_v48  ;;  %v3402_v37 = vpop.f32.mrf.mxu1 }
 0x18e   : > { %3897 = vmatprep.mubr.f32.mxu1 %v5042_v0  ;;  %v3349_v23 = vpop.f32.mrf.mxu0 }
 0x18f   : > { %v841_v40 = vadd.f32 %v3399_v5, %v3349_v23  ;;  %v846_v16 = vpop.f32.mrf.mxu1 }
 0x190   : > { %3842 = vmatmul.mubr.f32.gmra.mxu0 %v5735_v49  ;;  %v605_v56 = vpop.f32.mrf.mxu0 }
 0x191   : > { %3898 = vmatmul.mubr.f32.gmra.mxu1 %v5065_v60  ;;  %3844 = vmatprep.mubr.f32.mxu0 %v5001_v30  ;;  %v835_v14 = vadd.f32 %v834_v28, %v605_v56  ;;  %v3487_v27 = vpop.f32.mrf.mxu1 }
 0x192   : > { %3900 = vmatprep.mubr.f32.mxu1 %v5074_v55 }
 0x193   : > { %v1122_v51 = vpop.f32.mrf.mxu1 }
 0x194   : > { %3845 = vmatmul.mubr.f32.gmra.mxu0 %v5032_v18 }
 0x195   : > { %3901 = vmatmul.mubr.f32.gmra.mxu1 %v5089_v12  ;;  %3847 = vmatprep.mubr.f32.mxu0 %v5042_v0  ;;  %v3352_v54 = vpop.f32.mrf.mxu0 }
 0x196   : > { %v853_v53 = vadd.f32 %v3402_v37, %v3352_v54  ;;  %v3490_v13 = vpop.f32.mrf.mxu1 }
 0x197   : > { %v625_v45 = vpop.f32.mrf.mxu0 }
 0x198   : > { %3848 = vmatmul.mubr.f32.gmra.mxu0 %v5065_v60  ;;  %v847_v32 = vadd.f32 %v846_v16, %v625_v45  ;;  %v1138_v30 = vpop.f32.mrf.mxu1 }
 0x199   : > { %3850 = vmatprep.mubr.f32.mxu0 %v5074_v55 }
 0x19b   : > { %v3437_v62 = vpop.f32.mrf.mxu0 }
 0x19c   : > { %3851 = vmatmul.mubr.f32.gmra.mxu0 %v5089_v12  ;;  %v964_v15 = vadd.f32 %v3437_v62, %v5219_v20  ;;  %v3493_v0 = vpop.f32.mrf.mxu1 }
 0x19d   : > { %v956_v18 = vpop.f32.mrf.mxu0 }
 0x19e   : > { %v957_v34 = vadd.f32 %v956_v18, %v5225_v26  ;;  %v1131_v24 = vadd.f32 %v3487_v27, %v964_v15  ;;  %v1154_v31 = vpop.f32.mrf.mxu1 }
 0x1a0   : > { %v1123_v35 = vadd.f32 %v1122_v51, %v957_v34 }
 0x1a1   : > { %v3440_v7 = vpop.f32.mrf.mxu0 }
 0x1a2   : > { %v978_v41 = vadd.f32 %v3440_v7, %v5242_v39  ;;  %v3496_v8 = vpop.f32.mrf.mxu1 }
 0x1a3   : > { %v970_v60 = vpop.f32.mrf.mxu0 }
 0x1a4   : > { %v971_v3 = vadd.f32 %v970_v60, %v5248_v46  ;;  %v1147_v55 = vadd.f32 %v3490_v13, %v978_v41  ;;  %v1170_v20 = vpop.f32.mrf.mxu1 }
 0x1a6   : > { %v1139_v4 = vadd.f32 %v1138_v30, %v971_v3 }
 0x1a7   : > { %v3443_v9 = vpop.f32.mrf.mxu0 }
 0x1a8   : > { %v992_v12 = vadd.f32 %v3443_v9, %v5262_v61  ;;  %v3499_v29 = vpop.f32.mrf.mxu1 }
 0x1a9   : > { %v984_v10 = vpop.f32.mrf.mxu0 }
 0x1aa   : > { %v985_v17 = vadd.f32 %v984_v10, %v5268_v11  ;;  %v1163_v19 = vadd.f32 %v3493_v0, %v992_v12  ;;  %v1186_v46 = vpop.f32.mrf.mxu1 }
 0x1ac   : > { %v1155_v21 = vadd.f32 %v1154_v31, %v985_v17 }
 0x1ad   : > { %v3446_v22 = vpop.f32.mrf.mxu0 }
 0x1ae   : > { %v1006_v26 = vadd.f32 %v3446_v22, %v829_v2  ;;  %v3502_v61 = vpop.f32.mrf.mxu1 }
 0x1af   : > { %v998_v36 = vpop.f32.mrf.mxu0 }
 0x1b0   : > { %v999_v39 = vadd.f32 %v998_v36, %v823_v38  ;;  %v1179_v42 = vadd.f32 %v3496_v8, %v1006_v26  ;;  %v1202_v47 = vpop.f32.mrf.mxu1 }
 0x1b2   : > { %v1171_v43 = vadd.f32 %v1170_v20, %v999_v39 }
 0x1b3   : > { %v3449_v50 = vpop.f32.mrf.mxu0 }
 0x1b4   : > { %v1020_v52 = vadd.f32 %v3449_v50, %v841_v40 }
 0x1b5   : > { %v1012_v57 = vpop.f32.mrf.mxu0 }
 0x1b6   : > { %v1013_v63 = vadd.f32 %v1012_v57, %v835_v14  ;;  %v1195_v6 = vadd.f32 %v3499_v29, %v1020_v52 }
 0x1b8   : > { %v3452_v25 = vpop.f32.mrf.mxu0  ;;  %v1187_v33 = vadd.f32 %v1186_v46, %v1013_v63 }
 0x1b9   : > { %v1034_v11 = vadd.f32 %v3452_v25, %v853_v53 }
 0x1ba   : > { %v1026_v44 = vpop.f32.mrf.mxu0 }
 0x1bb   : > { %v1027_v48 = vadd.f32 %v1026_v44, %v847_v32  ;;  %v1211_v59 = vadd.f32 %v3502_v61, %v1034_v11 }
 0x1bd   : > { %v3587_v58 = vpop.f32.mrf.mxu1  ;;  %v1203_v2 = vadd.f32 %v1202_v47, %v1027_v48 }
 0x1bf   : > { %v1482_v5 = vpop.f32.mrf.mxu1 }
 0x1c2   : > { %v3590_v1 = vpop.f32.mrf.mxu1 }
 0x1c4   : > { %v1494_v38 = vpop.f32.mrf.mxu1 }
 0x1c6   : > { %v3537_v49 = vpop.f32.mrf.mxu0 }
 0x1c7   : > { %v1336_v28 = vadd.f32 %v3537_v49, %v1131_v24  ;;  %v3593_v16 = vpop.f32.mrf.mxu1 }
 0x1c8   : > { %v1329_v37 = vpop.f32.mrf.mxu0 }
 0x1c9   : > { %v5303_v23 = vadd.f32 %v3587_v58, %v1336_v28  ;;  %v1330_v40 = vadd.f32 %v1329_v37, %v1123_v35  ;;  %v1506_v54 = vpop.f32.mrf.mxu1 }
 0x1cb   : > { %v5305_v56 = vadd.f32 %v1482_v5, %v1330_v40 }
 0x1cc   : > { %v3540_v14 = vpop.f32.mrf.mxu0 }
 0x1cd   : > { %v1348_v27 = vadd.f32 %v3540_v14, %v1147_v55  ;;  %v3596_v30 = vpop.f32.mrf.mxu1 }
 0x1ce   : > { %v1341_v51 = vpop.f32.mrf.mxu0 }
 0x1cf   : > { %v5307_v53 = vadd.f32 %v3590_v1, %v1348_v27  ;;  %v1342_v13 = vadd.f32 %v1341_v51, %v1139_v4  ;;  %v1518_v24 = vpop.f32.mrf.mxu1 }
 0x1d1   : > { %v5309_v45 = vadd.f32 %v1494_v38, %v1342_v13 }
 0x1d2   : > { %v3543_v32 = vpop.f32.mrf.mxu0 }
 0x1d3   : > { %v1360_v62 = vadd.f32 %v3543_v32, %v1163_v19  ;;  %v3599_v31 = vpop.f32.mrf.mxu1 }
 0x1d4   : > { %v1353_v15 = vpop.f32.mrf.mxu0 }
 0x1d5   : > { %v5311_v18 = vadd.f32 %v3593_v16, %v1360_v62  ;;  %v1354_v34 = vadd.f32 %v1353_v15, %v1155_v21  ;;  %v1530_v8 = vpop.f32.mrf.mxu1 }
 0x1d7   : > { %5736 = vst [vmem:[#allocation15_spill] sm:$0xff] %v5311_v18  ;;  %v5313_v0 = vadd.f32 %v1506_v54, %v1354_v34 }
 0x1d8   : > { %v3546_v35 = vpop.f32.mrf.mxu0 }
 0x1d9   : > { %v1372_v7 = vadd.f32 %v3546_v35, %v1179_v42  ;;  %v3602_v19 = vpop.f32.mrf.mxu1 }
 0x1da   : > { %v1365_v41 = vpop.f32.mrf.mxu0 }
 0x1db   : > { %v5315_v60 = vadd.f32 %v3596_v30, %v1372_v7  ;;  %v1366_v3 = vadd.f32 %v1365_v41, %v1171_v43  ;;  %v1542_v39 = vpop.f32.mrf.mxu1 }
 0x1dd   : > { %5737 = vst [vmem:[#allocation42_spill] sm:$0xff] %v5315_v60  ;;  %v5317_v55 = vadd.f32 %v1518_v24, %v1366_v3 }
 0x1de   : > { %v3549_v4 = vpop.f32.mrf.mxu0 }
 0x1df   : > { %5738 = vst [vmem:[#allocation17_spill] sm:$0xff] %v5317_v55  ;;  %v1384_v9 = vadd.f32 %v3549_v4, %v1195_v6 }
 0x1e0   : > { %v1377_v12 = vpop.f32.mrf.mxu0 }
 0x1e1   : > { %v5319_v10 = vadd.f32 %v3599_v31, %v1384_v9  ;;  %v1378_v17 = vadd.f32 %v1377_v12, %v1187_v33 }
 0x1e3   : > { %5739 = vst [vmem:[#allocation44_spill] sm:$0xff] %v5319_v10  ;;  %v5321_v20 = vadd.f32 %v1530_v8, %v1378_v17  ;;  %v3552_v21 = vpop.f32.mrf.mxu0 }
 0x1e4   : > { %v1396_v22 = vadd.f32 %v3552_v21, %v1211_v59 }
 0x1e5   : > { %5740 = vst [vmem:[#allocation19_spill] sm:$0xff] %v5321_v20  ;;  %v1389_v26 = vpop.f32.mrf.mxu0 }
 0x1e6   : > { %v5323_v29 = vadd.f32 %v3602_v19, %v1396_v22  ;;  %v1390_v36 = vadd.f32 %v1389_v26, %v1203_v2 }
 0x1e8   : > { %5741 = vst [vmem:[#allocation21_spill] sm:$0xff] %v5323_v29  ;;  %v5325_v42 = vadd.f32 %v1542_v39, %v1390_v36 }
 0x1e9   : > { %v3687_v43 = vpop.f32.mrf.mxu1 }
 0x1ea   : > { %5742 = vst [vmem:[#allocation47_spill] sm:$0xff] %v5325_v42 }
 0x1eb   : > { %v1900_v46 = vpop.f32.mrf.mxu1 }
 0x1ee   : > { %v3690_v50 = vpop.f32.mrf.mxu1 }
 0x1f0   : > { %v1912_v57 = vpop.f32.mrf.mxu1 }
 0x1f2   : > { %v3637_v52 = vpop.f32.mrf.mxu0 }
 0x1f3   : > { %v3693_v6 = vpop.f32.mrf.mxu1  ;;  %v1907_v19 = vadd.f32 %v3687_v43, %v3637_v52 }
 0x1f4   : > { %v1639_v63 = vpop.f32.mrf.mxu0 }
 0x1f5   : > { %v1924_v25 = vpop.f32.mrf.mxu1  ;;  %v1901_v26 = vadd.f32 %v1900_v46, %v1639_v63 }
 0x1f8   : > { %v3640_v61 = vpop.f32.mrf.mxu0 }
 0x1f9   : > { %v5327_v11 = vpop.f32.mrf.mxu1  ;;  %v1919_v29 = vadd.f32 %v3690_v50, %v3640_v61 }
 0x1fa   : > { %v1659_v33 = vpop.f32.mrf.mxu0 }
 0x1fb   : > { %v5329_v47 = vpop.f32.mrf.mxu1  ;;  %v1913_v60 = vadd.f32 %v1912_v57, %v1659_v33 }
 0x1fe   : > { %v3643_v44 = vpop.f32.mrf.mxu0 }
 0x1ff   : > { %v5331_v59 = vpop.f32.mrf.mxu1 }
 0x200   : > { %v1679_v48 = vpop.f32.mrf.mxu0 }
 0x201   : > { %v5333_v2 = vpop.f32.mrf.mxu1 }
 0x204   : > { %v3646_v58 = vpop.f32.mrf.mxu0 }
 0x205   : > { %v5337_v1 = vpop.f32.mrf.mxu1 }
 0x206   : > { %v5335_v5 = vpop.f32.mrf.mxu0 }
 0x207   : > { %v5341_v38 = vpop.f32.mrf.mxu1 }
 0x208   : > { %5743 = vst [vmem:[#allocation23_spill] sm:$0xff] %v5341_v38 }
 0x20a   : > { %v5339_v49 = vpop.f32.mrf.mxu0 }
 0x20c   : > { %v5343_v28 = vpop.f32.mrf.mxu0 }
 0x20f   : > { %v5345_v16 = vpop.f32.mrf.mxu0 }
 0x211   : > { %v5347_v27 = vpop.f32.mrf.mxu0 }
 0x212   : > { %5744 = vst [vmem:[#allocation37_spill] sm:$0xff] %v5347_v27  ;;  %v1925_v27 = vadd.f32 %v1924_v25, %v1679_v48  ;;  %v1937_v25 = vadd.f32 %v5329_v47, %v5335_v5  ;;  %v2668_v47 = vmul.f32 %v5309_v45, %v5309_v45  ;;  %v1949_v5 = vadd.f32 %v5333_v2, %v5343_v28 }
 0x215   : > { %v3787_v37 = vpop.f32.mrf.mxu1 }
 0x217   : > { %v2236_v40 = vpop.f32.mrf.mxu1 }
 0x21a   : > { %v3790_v14 = vpop.f32.mrf.mxu1 }
 0x21c   : > { %v2252_v54 = vpop.f32.mrf.mxu1 }
 0x21e   : > { %v3737_v51 = vpop.f32.mrf.mxu0 }
 0x21f   : > { %v3793_v32 = vpop.f32.mrf.mxu1  ;;  %v2078_v36 = vadd.f32 %v3737_v51, %v1907_v19 }
 0x220   : > { %v2070_v13 = vpop.f32.mrf.mxu0 }
 0x221   : > { %v2268_v15 = vpop.f32.mrf.mxu1  ;;  %v2071_v42 = vadd.f32 %v2070_v13, %v1901_v26  ;;  %v2667_v13 = vmul.f32 %v5303_v23, %v5303_v23 }
 0x223   : > { %v2237_v52 = vadd.f32 %v2236_v40, %v2071_v42  ;;  %v2666_v42 = vmul.f32 %v5305_v56, %v5305_v56 }
 0x224   : > { %v3740_v30 = vpop.f32.mrf.mxu0 }
 0x225   : > { %v5349_v24 = vpop.f32.mrf.mxu1  ;;  %v2092_v55 = vadd.f32 %v3740_v30, %v1919_v29  ;;  %v1943_v29 = vadd.f32 %v5327_v11, %v3646_v58  ;;  %v1955_v11 = vadd.f32 %v5331_v59, %v5339_v49 }
 0x226   : > { %v2084_v62 = vpop.f32.mrf.mxu0 }
 0x227   : > { %v5351_v7 = vpop.f32.mrf.mxu1  ;;  %v2085_v38 = vadd.f32 %v2084_v62, %v1913_v60  ;;  %v2261_v61 = vadd.f32 %v3790_v14, %v2092_v55 }
 0x229   : > { %v2253_v30 = vadd.f32 %v2252_v54, %v2085_v38 }
 0x22a   : > { %v3743_v34 = vpop.f32.mrf.mxu0 }
 0x22b   : > { %v5353_v31 = vpop.f32.mrf.mxu1 }
 0x22c   : > { %v2098_v35 = vpop.f32.mrf.mxu0  ;;  %5745 = vst [vmem:[#allocation24_spill] sm:$0xff] %v5353_v31 }
 0x22d   : > { %v5355_v4 = vpop.f32.mrf.mxu1  ;;  %v2099_v57 = vadd.f32 %v2098_v35, %v1925_v27 }
 0x22e   : > { %5746 = vst [vmem:[#allocation25_spill] sm:$0xff] %v5355_v4  ;;  %v1931_v4 = vadd.f32 %v3693_v6, %v3643_v44 }
 0x22f   : > { %v2269_v35 = vadd.f32 %v2268_v15, %v2099_v57 }
 0x230   : > { %v3746_v41 = vpop.f32.mrf.mxu0 }
 0x231   : > { %v5357_v9 = vpop.f32.mrf.mxu1  ;;  %v2120_v40 = vadd.f32 %v3746_v41, %v1943_v29 }
 0x232   : > { %v2112_v3 = vpop.f32.mrf.mxu0  ;;  %5747 = vst [vmem:[#allocation26_spill] sm:$0xff] %v5357_v9  ;;  %v2245_v9 = vadd.f32 %v3787_v37, %v2078_v36 }
 0x233   : > { %v5361_v17 = vpop.f32.mrf.mxu1  ;;  %v2113_v58 = vadd.f32 %v2112_v3, %v1937_v25  ;;  %v2293_v59 = vadd.f32 %v5349_v24, %v2120_v40  ;;  %v2670_v24 = vmul.f32 %v5313_v0, %v5313_v0 }
 0x234   : > { %5748 = vst [vmem:[#allocation28_spill] sm:$0xff] %v5361_v17 }
 0x235   : > { %v2285_v45 = vadd.f32 %v5351_v7, %v2113_v58  ;;  %v5753_v7 = vld [vmem:[#allocation24_spill] sm:$0xff] }
 0x236   : > { %v3749_v8 = vpop.f32.mrf.mxu0 }
 0x237   : > { %v2134_v41 = vadd.f32 %v3749_v8, %v1955_v11  ;;  %v2669_v8 = vmul.f32 %v5307_v53, %v5307_v53 }
 0x238   : > { %v5359_v12 = vpop.f32.mrf.mxu0 }
 0x23b   : > { %v5363_v22 = vpop.f32.mrf.mxu0 }
 0x23c   : > { %5749 = vst [vmem:[#allocation36_spill] sm:$0xff] %v5363_v22  ;;  %v2106_v22 = vadd.f32 %v3743_v34, %v1931_v4 }
 0x23d   : > { %v5365_v20 = vpop.f32.mrf.mxu0 }
 0x23e   : > { %v2277_v55 = vadd.f32 %v3793_v32, %v2106_v22  ;;  %v5751_v22 = vld [vmem:[#allocation23_spill] sm:$0xff] }
 0x241   : > { %v3887_v21 = vpop.f32.mrf.mxu1 }
 0x243   : > { %v2596_v39 = vpop.f32.mrf.mxu1 }
 0x245   : > { %v3890_v10 = vpop.f32.mrf.mxu1 }
 0x247   : > { %v2608_v18 = vpop.f32.mrf.mxu1 }
 0x248   : > { %v3837_v31 = vpop.f32.mrf.mxu0 }
 0x249   : > { %v2450_v17 = vadd.f32 %v3837_v31, %v2245_v9  ;;  %v3893_v43 = vpop.f32.mrf.mxu1 }
 0x24a   : > { %v2443_v46 = vpop.f32.mrf.mxu0 }
 0x24b   : > { %v2603_v63 = vadd.f32 %v3887_v21, %v2450_v17  ;;  %v2444_v51 = vadd.f32 %v2443_v46, %v2237_v52  ;;  %v2620_v50 = vpop.f32.mrf.mxu1  ;;  %v5750_v21 = vld [vmem:[#allocation37_spill] sm:$0xff] }
 0x24c   : > { %v3840_v33 = vpop.f32.mrf.mxu0 }
 0x24d   : > { %v2679_v6 = vmul.f32 %v2603_v63, %v2603_v63  ;;  %v2597_v44 = vadd.f32 %v2596_v39, %v2444_v51  ;;  %v2462_v60 = vadd.f32 %v3840_v33, %v2261_v61  ;;  %v3896_v37 = vpop.f32.mrf.mxu1  ;;  %v5755_v33 = vld [vmem:[#allocation15_spill] sm:$0xff] }
 0x24e   : > { %v2455_v48 = vpop.f32.mrf.mxu0 }
 0x24f   : > { %v2678_v14 = vmul.f32 %v2597_v44, %v2597_v44  ;;  %v2456_v23 = vadd.f32 %v2455_v48, %v2253_v30  ;;  %v2691_v62 = vsub.f32 %v2667_v13, %v2679_v6  ;;  %v2632_v27 = vpop.f32.mrf.mxu1  ;;  %v2615_v38 = vadd.f32 %v3890_v10, %v2462_v60  ;;  %v5756_v44 = vld [vmem:[#allocation17_spill] sm:$0xff] }
 0x250   : > { %v3843_v34 = vpop.f32.mrf.mxu0  ;;  %v1967_v10 = vadd.f32 %v5337_v1, %v5345_v16  ;;  %v1961_v1 = vadd.f32 %v5751_v22, %v5750_v21  ;;  %v2671_v6 = vmul.f32 %v5755_v33, %v5755_v33  ;;  %v2672_v60 = vmul.f32 %v5756_v44, %v5756_v44 }
 0x251   : > { %v2609_v54 = vadd.f32 %v2608_v18, %v2456_v23  ;;  %v2474_v31 = vadd.f32 %v3843_v34, %v2277_v55  ;;  %2704 = vadd.xlane.f32.xlu1 %v2691_v62  ;;  %v2690_v56 = vsub.f32 %v2666_v42, %v2678_v14  ;;  %v2127_v18 = vadd.f32 %v5359_v12, %v1949_v5  ;;  %v3899_v15 = vpop.f32.mrf.mxu1  ;;  %v5752_v12 = vld [vmem:[#allocation36_spill] sm:$0xff] }
 0x252   : > { %v2467_v32 = vpop.f32.mrf.mxu0  ;;  %v2681_v17 = vmul.f32 %v2615_v38, %v2615_v38  ;;  %v2148_v26 = vadd.f32 %v5752_v12, %v1967_v10  ;;  %v2141_v52 = vadd.f32 %v5365_v20, %v1961_v1  ;;  %v5757_v20 = vld [vmem:[#allocation26_spill] sm:$0xff]  ;;  %v5758_v14 = vld [vmem:[#allocation28_spill] sm:$0xff]  ;;  %v5764_v21 = vlaneseq }
 0x253   : > { %v2680_v4 = vmul.f32 %v2609_v54, %v2609_v54  ;;  %v2468_v9 = vadd.f32 %v2467_v32, %v2269_v35  ;;  %2702 = vadd.xlane.f32.xlu0 %v2690_v56  ;;  %v2627_v49 = vadd.f32 %v3893_v43, %v2474_v31  ;;  %v2309_v43 = vadd.f32 %v5753_v7, %v2134_v41  ;;  %v2644_v63 = vpop.f32.mrf.mxu1  ;;  %v5759_v35 = vld [vmem:[#allocation42_spill] sm:$0xff]  ;;  %v5760_v31 = vld [vmem:[#allocation19_spill] sm:$0xff] }
 0x254   : > { %v3846_v3 = vpop.f32.mrf.mxu0  ;;  %v2693_v57 = vsub.f32 %v2669_v8, %v2681_v17  ;;  %v2317_v23 = vadd.f32 %v5758_v14, %v2141_v52  ;;  %v2673_v38 = vmul.f32 %v5759_v35, %v5759_v35  ;;  %v2674_v56 = vmul.f32 %v5760_v31, %v5760_v31 }
 0x255   : > { %v2621_v19 = vadd.f32 %v2620_v50, %v2468_v9  ;;  %v2486_v2 = vadd.f32 %v3846_v3, %v2293_v59  ;;  %v2692_v28 = vsub.f32 %v2668_v47, %v2680_v4  ;;  %v2683_v46 = vmul.f32 %v2627_v49, %v2627_v49  ;;  %v5754_v50 = vld [vmem:[#allocation25_spill] sm:$0xff]  ;;  %v3902_v55 = vpop.f32.mrf.mxu1 }
 0x256   : > { %v2479_v16 = vpop.f32.mrf.mxu0  ;;  %v2301_v61 = vadd.f32 %v5754_v50, %v2127_v18  ;;  %v5761_v18 = vld [vmem:[#allocation44_spill] sm:$0xff]  ;;  %v5412_v22 = vshrl.u32 %v5764_v21, 7 }
 0x257   : > { %v2682_v36 = vmul.f32 %v2621_v19, %v2621_v19  ;;  %v2480_v39 = vadd.f32 %v2479_v16, %v2285_v45  ;;  %2706 = vadd.xlane.f32.xlu0 %v2692_v28  ;;  %v2639_v51 = vadd.f32 %v3896_v37, %v2486_v2  ;;  %v2325_v37 = vadd.f32 %v5757_v20, %v2148_v26  ;;  %v2656_v32 = vpop.f32.mrf.mxu1  ;;  %v5763_v28 = vld [vmem:[#allocation21_spill] sm:$0xff] }
 0x258   : > { %v3849_v53 = vpop.f32.mrf.mxu0  ;;  %v2695_v62 = vsub.f32 %v2671_v6, %v2683_v46  ;;  %v2675_v49 = vmul.f32 %v5761_v18, %v5761_v18  ;;  %v2677_v8 = vmul.f32 %v5763_v28, %v5763_v28  ;;  %v2754_v1 = vadd.s32 8, %v5412_v22 }
 0x259   : > { %v2633_v0 = vadd.f32 %v2632_v27, %v2480_v39  ;;  %v2498_v13 = vadd.f32 %v3849_v53, %v2309_v43  ;;  %v2694_v29 = vsub.f32 %v2670_v24, %v2682_v36  ;;  %v2685_v48 = vmul.f32 %v2639_v51, %v2639_v51 }
 0x25a   : > { %v2491_v30 = vpop.f32.mrf.mxu0  ;;  %v5416_v16 = vstv %s2751_s25  ;;  %v2755_v36 = vadd.s32 16, %v5412_v22  ;;  %v2757_v52 = vadd.s32 32, %v5412_v22  ;;  %v2756_v46 = vadd.s32 24, %v5412_v22 }
 0x25b   : > { %v2684_v42 = vmul.f32 %v2633_v0, %v2633_v0  ;;  %v2492_v25 = vadd.f32 %v2491_v30, %v2301_v61  ;;  %2710 = vadd.xlane.f32.xlu1 %v2694_v29  ;;  %2708 = vadd.xlane.f32.xlu0 %v2693_v57  ;;  %v2651_v11 = vadd.f32 %v3899_v15, %v2498_v13  ;;  %v5762_v15 = vld [vmem:[#allocation47_spill] sm:$0xff]  ;;  %v2759_v29 = vadd.s32 48, %v5412_v22 }
 0x25c   : > { %v3852_v40 = vpop.f32.mrf.mxu0  ;;  %v2697_v41 = vsub.f32 %v2673_v38, %v2685_v48  ;;  %v2676_v3 = vmul.f32 %v5762_v15, %v5762_v15  ;;  %v2766_v26 = vadd.s32 %v5416_v16, %v5412_v22  ;;  %v2767_v39 = vadd.s32 %v5416_v16, %v2754_v1 }
 0x25d   : > { %v2645_v58 = vadd.f32 %v2644_v63, %v2492_v25  ;;  %v2510_v27 = vadd.f32 %v3852_v40, %v2325_v37  ;;  %v2696_v34 = vsub.f32 %v2672_v60, %v2684_v42  ;;  %v2687_v4 = vmul.f32 %v2651_v11, %v2651_v11 }
 0x25e   : > { %v2503_v54 = vpop.f32.mrf.mxu0  ;;  %vm2778_vm4 = vcmp.lt.s32.totalorder %v2766_v26, 188  ;;  %v2768_v53 = vadd.s32 %v5416_v16, %v2755_v36  ;;  %vm2779_vm5 = vcmp.lt.s32.totalorder %v2767_v39, 188  ;;  %v2770_v0 = vadd.s32 %v5416_v16, %v2757_v52 }
 0x25f   : > { %v2686_v47 = vmul.f32 %v2645_v58, %v2645_v58  ;;  %v2504_v5 = vadd.f32 %v2503_v54, %v2317_v23  ;;  %2714 = vadd.xlane.f32.xlu1 %v2696_v34  ;;  %2712 = vadd.xlane.f32.xlu0 %v2695_v62  ;;  %v2663_v9 = vadd.f32 %v3902_v55, %v2510_v27  ;;  %v2758_v44 = vadd.s32 40, %v5412_v22 }
 0x260   : > { %v2699_v19 = vsub.f32 %v2675_v49, %v2687_v4  ;;  %v2769_v13 = vadd.s32 %v5416_v16, %v2756_v46  ;;  %vm2780_vm7 = vcmp.lt.s32.totalorder %v2768_v53, 188  ;;  %vm2782_vm8 = vcmp.lt.s32.totalorder %v2770_v0, 188 }
 0x261   : > { %v2657_v59 = vadd.f32 %v2656_v32, %v2504_v5  ;;  %v2698_v10 = vsub.f32 %v2674_v56, %v2686_v47  ;;  %v2689_v17 = vmul.f32 %v2663_v9, %v2663_v9  ;;  %v2772_v20 = vadd.s32 %v5416_v16, %v2759_v29 }
 0x262   : > { %vm2781_vm9 = vcmp.lt.s32.totalorder %v2769_v13, 188  ;;  %v2761_v37 = vadd.s32 64, %v5412_v22  ;;  %v2771_v11 = vadd.s32 %v5416_v16, %v2758_v44  ;;  %v2760_v58 = vadd.s32 56, %v5412_v22 }
 0x263   : > { %v2688_v45 = vmul.f32 %v2657_v59, %v2657_v59  ;;  %2718 = vadd.xlane.f32.xlu1 %v2698_v10  ;;  %2716 = vadd.xlane.f32.xlu0 %v2697_v41  ;;  %v2701_v24 = vsub.f32 %v2677_v8, %v2689_v17  ;;  %vm2784_vm10 = vcmp.lt.s32.totalorder %v2772_v20, 188  ;;  %v2762_v9 = vadd.s32 72, %v5412_v22 }
 0x264   : > { %v2774_v31 = vadd.s32 %v5416_v16, %v2761_v37  ;;  %vm2783_vm11 = vcmp.lt.s32.totalorder %v2771_v11, 188  ;;  %v2773_v4 = vadd.s32 %v5416_v16, %v2760_v58  ;;  %v2763_v49 = vadd.s32 80, %v5412_v22 }
 0x265   : > { %v2700_v2 = vsub.f32 %v2676_v3, %v2688_v45  ;;  %v2775_v21 = vadd.s32 %v5416_v16, %v2762_v9  ;;  %v2764_v1 = vadd.s32 88, %v5412_v22 }
 0x266   : > { %vm2786_vm12 = vcmp.lt.s32.totalorder %v2774_v31, 188  ;;  %vm2785_vm13 = vcmp.lt.s32.totalorder %v2773_v4, 188  ;;  %v2776_v36 = vadd.s32 %v5416_v16, %v2763_v49 }
 0x267   : > { %2720 = vadd.xlane.f32.xlu0 %v2699_v19  ;;  %2722 = vadd.xlane.f32.xlu1 %v2700_v2  ;;  %vm2787_vm14 = vcmp.lt.s32.totalorder %v2775_v21, 188 }
 0x268   : > { %vm2788_vm15 = vcmp.lt.s32.totalorder %v2776_v36, 188 }
 0x26b   : > { %2724 = vadd.xlane.f32.xlu0 %v2701_v24 }
 0x2da   : > { %v2705_v12 = vpop.xlane.xlu1 %2704 }
 0x2db   : > { %v2727_v7 = vadd.f32 1.0, %v2705_v12 }
 0x2dc   : > { %v2703_v43 = vpop.xlane.xlu0 %2702 }
 0x2dd   : > { %v2726_v63 = vadd.f32 1.0, %v2703_v43  ;;  %v2739_v51 = vmax.f32 %v2727_v7, 0.0 }
 0x2df   : > { %v2738_v50 = vmax.f32 %v2726_v63, 0.0  ;;  %v2791_v6 = vsel %vm2779_vm5, %v2739_v51, 0.0 }
 0x2e0   : > { %v2707_v61 = vpop.xlane.xlu0 %2706  ;;  %v2805_v48 = vsel %vm2803_vm6, %v2791_v6, 0.0 }
 0x2e1   : > { %v2790_v57 = vsel %vm2778_vm4, %v2738_v50, 0.0  ;;  %v2728_v33 = vadd.f32 1.0, %v2707_v61  ;;  %v2777_v61 = vadd.s32 %v5416_v16, %v2764_v1 }
 0x2e2   : > { %v2804_v60 = vsel %vm2803_vm6, %v2790_v57, 0.0 }
 0x2e3   : > { %v2740_v30 = vmax.f32 %v2728_v33, 0.0  ;;  %v2806_v23 = vadd.f32 %v2805_v48, %v2804_v60  ;;  %vm2789_vm0 = vcmp.lt.s32.totalorder %v2777_v61, 188 }
 0x2e4   : > { %v2711_v42 = vpop.xlane.xlu1 %2710  ;;  %v2709_v25 = vpop.xlane.xlu0 %2708 }
 0x2e5   : > { %v2792_v55 = vsel %vm2780_vm7, %v2740_v30, 0.0  ;;  %v2730_v40 = vadd.f32 1.0, %v2711_v42  ;;  %v2729_v14 = vadd.f32 1.0, %v2709_v25 }
 0x2e6   : > { %v2807_v62 = vsel %vm2803_vm6, %v2792_v55, 0.0 }
 0x2e7   : > { %v2742_v27 = vmax.f32 %v2730_v40, 0.0  ;;  %v2741_v34 = vmax.f32 %v2729_v14, 0.0  ;;  %v2808_v35 = vadd.f32 %v2807_v62, %v2806_v23 }
 0x2e8   : > { %v2715_v38 = vpop.xlane.xlu1 %2714  ;;  %v2713_v54 = vpop.xlane.xlu0 %2712 }
 0x2e9   : > { %v2794_v56 = vsel %vm2782_vm8, %v2742_v27, 0.0  ;;  %v2793_v47 = vsel %vm2781_vm9, %v2741_v34, 0.0  ;;  %v2732_v5 = vadd.f32 1.0, %v2715_v38  ;;  %v2731_v32 = vadd.f32 1.0, %v2713_v54 }
 0x2ea   : > { %v2809_v41 = vsel %vm2803_vm6, %v2793_v47, 0.0  ;;  %v2811_v15 = vsel %vm2803_vm6, %v2794_v56, 0.0 }
 0x2eb   : > { %v2810_v59 = vadd.f32 %v2809_v41, %v2808_v35  ;;  %v2744_v10 = vmax.f32 %v2732_v5, 0.0  ;;  %v2743_v18 = vmax.f32 %v2731_v32, 0.0 }
 0x2ec   : > { %v2719_v3 = vpop.xlane.xlu1 %2718  ;;  %v2717_v45 = vpop.xlane.xlu0 %2716 }
 0x2ed   : > { %v2796_v17 = vsel %vm2784_vm10, %v2744_v10, 0.0  ;;  %v2812_v19 = vadd.f32 %v2811_v15, %v2810_v59  ;;  %v2795_v2 = vsel %vm2783_vm11, %v2743_v18, 0.0  ;;  %v2734_v28 = vadd.f32 1.0, %v2719_v3 }
 0x2ee   : > { %v2813_v8 = vsel %vm2803_vm6, %v2795_v2, 0.0  ;;  %v2733_v24 = vadd.f32 1.0, %v2717_v45  ;;  %v2815_v39 = vsel %vm2803_vm6, %v2796_v17, 0.0 }
 0x2ef   : > { %v2814_v12 = vadd.f32 %v2813_v8, %v2812_v19  ;;  %v2746_v26 = vmax.f32 %v2734_v28, 0.0 }
 0x2f0   : > { %v2745_v7 = vmax.f32 %v2733_v24, 0.0  ;;  %v2721_v43 = vpop.xlane.xlu0 %2720  ;;  %v2723_v52 = vpop.xlane.xlu1 %2722 }
 0x2f1   : > { %v2816_v46 = vadd.f32 %v2815_v39, %v2814_v12  ;;  %v2735_v63 = vadd.f32 1.0, %v2721_v43  ;;  %v2736_v51 = vadd.f32 1.0, %v2723_v52  ;;  %v2798_v53 = vsel %vm2786_vm12, %v2746_v26, 0.0 }
 0x2f2   : > { %v2797_v50 = vsel %vm2785_vm13, %v2745_v7, 0.0  ;;  %v2819_v33 = vsel %vm2803_vm6, %v2798_v53, 0.0 }
 0x2f3   : > { %v2817_v22 = vsel %vm2803_vm6, %v2797_v50, 0.0  ;;  %v2747_v0 = vmax.f32 %v2735_v63, 0.0  ;;  %v2748_v13 = vmax.f32 %v2736_v51, 0.0 }
 0x2f4   : > { %v2818_v29 = vadd.f32 %v2817_v22, %v2816_v46  ;;  %v2725_v57 = vpop.xlane.xlu0 %2724 }
 0x2f5   : > { %v2799_v6 = vsel %vm2787_vm14, %v2747_v0, 0.0  ;;  %v2737_v44 = vadd.f32 1.0, %v2725_v57  ;;  %v2800_v42 = vsel %vm2788_vm15, %v2748_v13, 0.0 }
 0x2f6   : > { %v2820_v60 = vadd.f32 %v2819_v33, %v2818_v29  ;;  %v2821_v30 = vsel %vm2803_vm6, %v2799_v6, 0.0  ;;  %v2823_v16 = vsel %vm2803_vm6, %v2800_v42, 0.0 }
 0x2f7   : > { %v2749_v25 = vmax.f32 %v2737_v44, 0.0 }
 0x2f8   : > { %v2822_v20 = vadd.f32 %v2821_v30, %v2820_v60 }
 0x2f9   : > { %v2801_v37 = vsel %vm2789_vm0, %v2749_v25, 0.0 }
 0x2fa   : > { %v2824_v48 = vadd.f32 %v2823_v16, %v2822_v20  ;;  %v2825_v55 = vsel %vm2803_vm6, %v2801_v37, 0.0 }
 0x2fc   : > { %v2826_v40 = vadd.f32 %v2825_v55, %v2824_v48 }
 0x2fe   : > { %2827 = vadd.xlane.f32.xlu1 %v2826_v40 }
 0x387   : > { %v2828_v14 = vpop.xlane.xlu1 %2827 }
 0x388   : > { %v2829_v23 = vrot.slane %v2828_v14, 4 }
 0x38a   : > { %v2830_v62 = vadd.f32 %v2829_v23, %v2828_v14 }
 0x38c   : > { %v2831_v11 = vrot.slane %v2830_v62, 2 }
 0x38e   : > { %v2832_v58 = vadd.f32 %v2831_v11, %v2830_v62 }
 0x390   : > { %v2833_v27 = vrot.slane %v2832_v58, 1 }
 0x392   : > { %v2834_v34 = vadd.f32 %v2833_v27, %v2832_v58 }
 0x394   : > { %3903 = vpush %v2834_v34 }
 0x3c5   : > { %s3904_s30 = spop %3903 }
 0x3c6   : > { %v2836_v35 = vstv %s3904_s30 }
 0x3c7   : > { %2838 = vst [vmem:[%s154_s28] sm:$0xff] %v2836_v35 }
 0x3c8   : > { %3984 = shalt.err (!%p3981_p5)
}
 0x3c9   : > { %s3985_s16 = scalar_lea.hbm %s2851_s5, 128  ;;  %s3989_s24 = scalar_lea.hbm %s5498_s2, 256 }
 0x3ca   : > { %p3986_p6 = scmp.ne.s32.totalorder %s2851_s5, %s3985_s16  ;;  %p3990_p10 = scmp.lt.s32.totalorder %s2851_s5, %s5498_s2 }
 0x3cb   : > { %p3991_p11 = scmp.lt.s32.totalorder %s3989_s24, %s3985_s16 }
 0x3cc   : > { %p3987_p7 = pnand %p3986_p6, %p4109_p4 }
 0x3cd   : > { %p3992_p12 = por %p3991_p11, %p3990_p10 }
 0x3ce   : > { %p3988_p9 = pneg %p3987_p7 }
 0x3d0   : > { %p3993_p13 = pnand %p3992_p12, %p3988_p9 }
 0x3d2   : > { %3996 = shalt.err (!%p3993_p13)
}
 0x3d3   : > { %3905 = dma.vmem_to_hbm [thread:$0]  (%p4109_p4), %s2854_s29, 128, %s2851_s5, %s2840_s6  }
 0x3d4 PF: > { %p3911_p0 = scmp.ge.s32.totalorder %s4047_s14, 2  ;;  %s2865_s23 = sand.u32 1, %s4027_s9  }
 0x3d5   : > { %s2866_s27 = scalar_lea.sflag [#allocation3], %s2865_s23 }
 0x3d6   : > { %p3908_p1 = pnand %p3911_p0, %p4116_p8 }
 0x3d8   : > { %p3909_p2 = pneg %p3908_p1 }
 0x3da   : > { %4022 = dma.done.wait (%p3909_p2), %s2866_s27, 128  }
 0x3db   : > { %4024 = vsyncadd (%p3909_p2), %s2866_s27, 4294967168  ;;  %s15_s14 = sadd.s32 1, %s4047_s14   ;;  %s5765_s9 = smov %s4031_s10 }
 0x3dc   : > { %p12_p3 = scmp.ge.s32.totalorder %s15_s14, 4   ;;  %s5766_s10 = smov %s4035_s11 }
 0x3dd   : > { %s5767_s11 = smov %s4122_s22  ;;  %s5768_s12 = smov %s4043_s13 }
 0x3de   : > { %s5769_s13 = smov %s5771_s17  ;;  %14 = sbr.rel (!%p12_p3) target bundleno = 4 (0x4), region = 67 }
 0x3e3   :  { %2871 = vsyncpa [#allocation3], 1 }
 0x3e4   :  { %2873 = vsyncpa [#allocation3 + $0x1], 1 }

</bundles_post_ra>
